<compile_context>
chip_gen: v5e
topology: v5e:2x2
jax: 0.10.0
libtpu: 0.0.40
codegen_flags: <defaults>
</compile_context>

<pallas_src>
import jax
import jax.numpy as jnp
from jax import lax
from jax.experimental import pallas as pl
from jax.experimental.pallas import tpu as pltpu


# ----------------------------- Pallas kernels --------------------------------
def _conv1_relu_kernel(p_ref, w_ref, b_ref, o_ref):
    """out = relu(W1 @ P1 + b1)   (12, M1)"""
    y = jnp.dot(w_ref[...], p_ref[...], preferred_element_type=jnp.float32)
    o_ref[...] = jnp.maximum(y + b_ref[...], 0.0)


def _dsconv_relu_kernel(p_ref, wd_ref, bd_ref, wp_ref, bp_ref, o_ref):
    """Depthwise (as block-diagonal matmul) + pointwise 1x1 + ReLU, fused.

    p_ref : (108, M2) dilated 3x3 patches of the conv1 output
    wd_ref: (12, 108) block-diagonal depthwise weight (groups=6)
    wp_ref: (24, 12)  pointwise 1x1 weight
    """
    h = jnp.dot(wd_ref[...], p_ref[...], preferred_element_type=jnp.float32)
    h = h + bd_ref[...]
    y = jnp.dot(wp_ref[...], h, preferred_element_type=jnp.float32) + bp_ref[...]
    o_ref[...] = jnp.maximum(y, 0.0)


def _conv3_linear_kernel(p_ref, w3_ref, b3_ref, wl_ref, bl_ref, o_ref):
    """conv3 (6, N*256) then Flatten + Linear(1536, 10), fused.

    wl_ref: (6, 256, 10) linear weight rearranged so that
            wl_ref[c, p, o] == W_linear[o, c*256 + p]
    """
    out3 = jnp.dot(w3_ref[...], p_ref[...], preferred_element_type=jnp.float32)
    out3 = out3 + b3_ref[...]                       # (6, N*256)

    n_batch = o_ref.shape[0]
    c_out = out3.shape[0]
    hw = wl_ref.shape[1]                            # 256 (lane-aligned offsets)

    rows = []
    for n in range(n_batch):                        # static unroll (N=2)
        acc = bl_ref[...]                           # (1, 10)
        for c in range(c_out):                      # static unroll (6)
            acc = acc + jnp.dot(out3[c:c + 1, n * hw:(n + 1) * hw],
                                wl_ref[c],
                                preferred_element_type=jnp.float32)
        rows.append(acc)
    o_ref[...] = jnp.concatenate(rows, axis=0)      # (N, 10)


def _call(kernel, inputs, out_shape):
    shapes = [tuple(a.shape) for a in inputs]
    return pl.pallas_call(
        kernel,
        grid=(1,),
        in_specs=[pl.BlockSpec(s, lambda i, nd=len(s): (0,) * nd)
                  for s in shapes],
        out_specs=pl.BlockSpec(tuple(out_shape.shape),
                               lambda i, nd=len(out_shape.shape): (0,) * nd),
        out_shape=out_shape,
        compiler_params=pltpu.CompilerParams(
            dimension_semantics=("arbitrary",)),
    )(*inputs)


# ------------------------------ XLA glue --------------------------------------
def _im2col_T(x_nchw, k, dil=1):
    """(N,C,H,W) -> transposed patches (C*k*k, N*Ho*Wo) for a valid conv."""
    N, C, H, W = x_nchw.shape
    Ho = H - dil * (k - 1)
    Wo = W - dil * (k - 1)
    taps = [x_nchw[:, :, dil * dh:dil * dh + Ho, dil * dw:dil * dw + Wo]
            for dh in range(k) for dw in range(k)]
    pat = jnp.stack(taps, axis=0)                   # (k*k, N, C, Ho, Wo)
    pat = jnp.transpose(pat, (2, 0, 1, 3, 4))       # (C, k*k, N, Ho, Wo)
    return pat.reshape(C * k * k, N * Ho * Wo), Ho, Wo


def _grouped_weight_to_full(w, groups):
    """(Cout, Cin/g, kh, kw) grouped conv weight -> block-diag (Cout, Cin*kh*kw)."""
    cout, cin_g, kh, kw = w.shape
    out_g = cout // groups
    wflat = w.reshape(cout, cin_g * kh * kw)
    wm = jnp.zeros((cout, groups * cin_g * kh * kw), w.dtype)
    blk = cin_g * kh * kw
    for g in range(groups):
        wm = wm.at[g * out_g:(g + 1) * out_g,
                   g * blk:(g + 1) * blk].set(wflat[g * out_g:(g + 1) * out_g, :])
    return wm


def depth_cnn_forward(x, params):
    """Forward pass of Depth_CNN_Net_for_Mnist.  x: (N, 1, 28, 28) -> (N, 10)."""
    x = x.astype(jnp.float32)
    N = x.shape[0]

    # ---- stage 1: Conv2d(1, 12, k=7) + ReLU -----------------------------------
    p1, h1, w1s = _im2col_T(x, 7)                            # (49, N*484)
    w1 = params["w1"].reshape(12, -1)                        # (12, 49)
    out1 = _call(_conv1_relu_kernel,
                 (p1, w1, params["b1"].reshape(-1, 1)),
                 jax.ShapeDtypeStruct((12, N * h1 * w1s), jnp.float32))

    # ---- stage 2: depthwise(k=3, dil=2, groups=6) + pointwise 1x1 + ReLU ------
    x2 = out1.reshape(12, N, h1, w1s).transpose(1, 0, 2, 3)  # (N, 12, 22, 22)
    p2, h2, w2s = _im2col_T(x2, 3, dil=2)                    # (108, N*324)
    wd = _grouped_weight_to_full(params["wd"], groups=6)     # (12, 108)
    wp = params["wp"].reshape(24, 12)
    out2 = _call(_dsconv_relu_kernel,
                 (p2, wd, params["bd"].reshape(-1, 1),
                  wp, params["bp"].reshape(-1, 1)),
                 jax.ShapeDtypeStruct((24, N * h2 * w2s), jnp.float32))

    # ---- stage 3: Conv2d(24, 6, k=3) + Flatten + Linear(1536, 10) -------------
    x3 = out2.reshape(24, N, h2, w2s).transpose(1, 0, 2, 3)  # (N, 24, 18, 18)
    p3, h3, w3s = _im2col_T(x3, 3)                           # (216, N*256)
    w3 = params["w3"].reshape(6, -1)                         # (6, 216)
    hw = h3 * w3s                                            # 256
    wl = params["wl"].reshape(10, 6, hw).transpose(1, 2, 0)  # (6, 256, 10)
    logits = _call(_conv3_linear_kernel,
                   (p3, w3, params["b3"].reshape(-1, 1),
                    wl, params["bl"].reshape(1, -1)),
                   jax.ShapeDtypeStruct((N, 10), jnp.float32))
    return logits


# -------------------------- pure-JAX reference --------------------------------
def _reference(x, params):
    def conv(y, w, b, dil=1, groups=1):
        z = lax.conv_general_dilated(
            y, w, window_strides=(1, 1), padding="VALID",
            rhs_dilation=(dil, dil),
            dimension_numbers=("NCHW", "OIHW", "NCHW"),
            feature_group_count=groups)
        return z + b.reshape(1, -1, 1, 1)

    h = jax.nn.relu(conv(x, params["w1"], params["b1"]))
    h = conv(h, params["wd"], params["bd"], dil=2, groups=6)
    h = jax.nn.relu(conv(h, params["wp"], params["bp"]))
    h = conv(h, params["w3"], params["b3"])
    h = h.reshape(h.shape[0], -1)                            # (N, 1536)
    return h @ params["wl"].T + params["bl"]


# ---------------------------------- main --------------------------------------
if __name__ == "__main__":
    N = 2
    key = jax.random.PRNGKey(0)
    keys = jax.random.split(key, 11)

    x = jax.random.normal(keys[0], (N, 1, 28, 28), jnp.float32)

    params = {
        # Conv2d(1, 12, kernel_size=7)
        "w1": jax.random.normal(keys[1], (12, 1, 7, 7), jnp.float32) * 0.1,
        "b1": jax.random.normal(keys[2], (12,), jnp.float32) * 0.1,
        # Conv2d(12, 12, kernel_size=3, groups=6, dilation=2)
        "wd": jax.random.normal(keys[3], (12, 2, 3, 3), jnp.float32) * 0.1,
        "bd": jax.random.normal(keys[4], (12,), jnp.float32) * 0.1,
        # Conv2d(12, 24, kernel_size=1)
        "wp": jax.random.normal(keys[5], (24, 12, 1, 1), jnp.float32) * 0.1,
        "bp": jax.random.normal(keys[6], (24,), jnp.float32) * 0.1,
        # Conv2d(24, 6, kernel_size=3)
        "w3": jax.random.normal(keys[7], (6, 24, 3, 3), jnp.float32) * 0.1,
        "b3": jax.random.normal(keys[8], (6,), jnp.float32) * 0.1,
        # Linear(1536, 10)
        "wl": jax.random.normal(keys[9], (10, 1536), jnp.float32) * 0.05,
        "bl": jax.random.normal(keys[10], (10,), jnp.float32) * 0.1,
    }

    fwd = jax.jit(depth_cnn_forward)
    out = jax.block_until_ready(fwd(x, params))
    ref = jax.block_until_ready(_reference(x, params))

    assert out.shape == (N, 10), out.shape
    assert jnp.allclose(out, ref, rtol=1e-3, atol=1e-3), \
        float(jnp.max(jnp.abs(out - ref)))

    print("KERNEL_OK")
</pallas_src>

<mosaic_0001>
module attributes {stable_mosaic.version = 11 : i64} {
  func.func @_conv1_relu_kernel(%arg0: i32, %arg1: memref<49x968xf32, #tpu.memory_space<vmem>>, %arg2: memref<12x49xf32, #tpu.memory_space<vmem>>, %arg3: memref<12x1xf32, #tpu.memory_space<vmem>>, %arg4: memref<12x968xf32, #tpu.memory_space<vmem>>) attributes {dimension_semantics = [#tpu.dimension_semantics<arbitrary>], iteration_bounds = array<i64: 1>, scalar_prefetch = 0 : i64, scratch_operands = 0 : i64, tpu.core_type = #tpu.core_type<tc>, window_params = [{pipeline_mode = #tpu.pipeline_mode<synchronous>, transform_indices = @transform_0, window_bounds = array<i64: 49, 968>}, {pipeline_mode = #tpu.pipeline_mode<synchronous>, transform_indices = @transform_1, window_bounds = array<i64: 12, 49>}, {pipeline_mode = #tpu.pipeline_mode<synchronous>, transform_indices = @transform_2, window_bounds = array<i64: 12, 1>}, {pipeline_mode = #tpu.pipeline_mode<synchronous>, transform_indices = @transform_3, window_bounds = array<i64: 12, 968>}]} {
    %c0 = arith.constant 0 : index
    %c0_0 = arith.constant 0 : index
    %0 = vector.load %arg2[%c0, %c0_0] : memref<12x49xf32, #tpu.memory_space<vmem>>, vector<12x49xf32>
    %c0_1 = arith.constant 0 : index
    %c0_2 = arith.constant 0 : index
    %1 = vector.load %arg1[%c0_1, %c0_2] : memref<49x968xf32, #tpu.memory_space<vmem>>, vector<49x968xf32>
    %cst = arith.constant dense<0.000000e+00> : vector<12x968xf32>
    %2 = tpu.matmul %0, %1, %cst {dimension_numbers = #tpu.dot_dimension_numbers<[1], [0], [0], [1], [0, 0, 1, 1], [], []>} : vector<12x49xf32>, vector<49x968xf32>, vector<12x968xf32> -> vector<12x968xf32>
    %c0_3 = arith.constant 0 : index
    %c0_4 = arith.constant 0 : index
    %3 = vector.load %arg3[%c0_3, %c0_4] : memref<12x1xf32, #tpu.memory_space<vmem>>, vector<12x1xf32>
    %4 = vector.broadcast %3 : vector<12x1xf32> to vector<12x968xf32>
    %5 = arith.addf %2, %4 : vector<12x968xf32>
    %cst_5 = arith.constant 0.000000e+00 : f32
    %6 = vector.broadcast %cst_5 : f32 to vector<12x968xf32>
    %7 = arith.maximumf %5, %6 : vector<12x968xf32>
    %c0_6 = arith.constant 0 : index
    %c0_7 = arith.constant 0 : index
    %8 = vector.load %arg4[%c0_6, %c0_7] : memref<12x968xf32, #tpu.memory_space<vmem>>, vector<12x968xf32>
    tpu.vector_store %arg4[%c0_6, %c0_7], %7 {strides = array<i32>} : memref<12x968xf32, #tpu.memory_space<vmem>>, vector<12x968xf32>,
    return
  }
  func.func @transform_0(%arg0: i32) -> (i32, i32) {
    %c0_i32 = arith.constant 0 : i32
    %c0_i32_0 = arith.constant 0 : i32
    %c0_i32_1 = arith.constant 0 : i32
    return %c0_i32, %c0_i32_0 : i32, i32
  }
  func.func @transform_1(%arg0: i32) -> (i32, i32) {
    %c0_i32 = arith.constant 0 : i32
    %c0_i32_0 = arith.constant 0 : i32
    %c0_i32_1 = arith.constant 0 : i32
    return %c0_i32, %c0_i32_0 : i32, i32
  }
  func.func @transform_2(%arg0: i32) -> (i32, i32) {
    %c0_i32 = arith.constant 0 : i32
    %c0_i32_0 = arith.constant 0 : i32
    %c0_i32_1 = arith.constant 0 : i32
    return %c0_i32, %c0_i32_0 : i32, i32
  }
  func.func @transform_3(%arg0: i32) -> (i32, i32) {
    %c0_i32 = arith.constant 0 : i32
    %c0_i32_0 = arith.constant 0 : i32
    %c0_i32_1 = arith.constant 0 : i32
    return %c0_i32, %c0_i32_0 : i32, i32
  }
}

module attributes {stable_mosaic.version = 11 : i64} {
  func.func @_dsconv_relu_kernel(%arg0: i32, %arg1: memref<108x648xf32, #tpu.memory_space<vmem>>, %arg2: memref<12x108xf32, #tpu.memory_space<vmem>>, %arg3: memref<12x1xf32, #tpu.memory_space<vmem>>, %arg4: memref<24x12xf32, #tpu.memory_space<vmem>>, %arg5: memref<24x1xf32, #tpu.memory_space<vmem>>, %arg6: memref<24x648xf32, #tpu.memory_space<vmem>>) attributes {dimension_semantics = [#tpu.dimension_semantics<arbitrary>], iteration_bounds = array<i64: 1>, scalar_prefetch = 0 : i64, scratch_operands = 0 : i64, tpu.core_type = #tpu.core_type<tc>, window_params = [{pipeline_mode = #tpu.pipeline_mode<synchronous>, transform_indices = @transform_0, window_bounds = array<i64: 108, 648>}, {pipeline_mode = #tpu.pipeline_mode<synchronous>, transform_indices = @transform_1, window_bounds = array<i64: 12, 108>}, {pipeline_mode = #tpu.pipeline_mode<synchronous>, transform_indices = @transform_2, window_bounds = array<i64: 12, 1>}, {pipeline_mode = #tpu.pipeline_mode<synchronous>, transform_indices = @transform_3, window_bounds = array<i64: 24, 12>}, {pipeline_mode = #tpu.pipeline_mode<synchronous>, transform_indices = @transform_4, window_bounds = array<i64: 24, 1>}, {pipeline_mode = #tpu.pipeline_mode<synchronous>, transform_indices = @transform_5, window_bounds = array<i64: 24, 648>}]} {
    %c0 = arith.constant 0 : index
    %c0_0 = arith.constant 0 : index
    %0 = vector.load %arg2[%c0, %c0_0] : memref<12x108xf32, #tpu.memory_space<vmem>>, vector<12x108xf32>
    %c0_1 = arith.constant 0 : index
    %c0_2 = arith.constant 0 : index
    %1 = vector.load %arg1[%c0_1, %c0_2] : memref<108x648xf32, #tpu.memory_space<vmem>>, vector<108x648xf32>
    %cst = arith.constant dense<0.000000e+00> : vector<12x648xf32>
    %2 = tpu.matmul %0, %1, %cst {dimension_numbers = #tpu.dot_dimension_numbers<[1], [0], [0], [1], [0, 0, 1, 1], [], []>} : vector<12x108xf32>, vector<108x648xf32>, vector<12x648xf32> -> vector<12x648xf32>
    %c0_3 = arith.constant 0 : index
    %c0_4 = arith.constant 0 : index
    %3 = vector.load %arg3[%c0_3, %c0_4] : memref<12x1xf32, #tpu.memory_space<vmem>>, vector<12x1xf32>
    %4 = vector.broadcast %3 : vector<12x1xf32> to vector<12x648xf32>
    %5 = arith.addf %2, %4 : vector<12x648xf32>
    %c0_5 = arith.constant 0 : index
    %c0_6 = arith.constant 0 : index
    %6 = vector.load %arg4[%c0_5, %c0_6] : memref<24x12xf32, #tpu.memory_space<vmem>>, vector<24x12xf32>
    %cst_7 = arith.constant dense<0.000000e+00> : vector<24x648xf32>
    %7 = tpu.matmul %6, %5, %cst_7 {dimension_numbers = #tpu.dot_dimension_numbers<[1], [0], [0], [1], [0, 0, 1, 1], [], []>} : vector<24x12xf32>, vector<12x648xf32>, vector<24x648xf32> -> vector<24x648xf32>
    %c0_8 = arith.constant 0 : index
    %c0_9 = arith.constant 0 : index
    %8 = vector.load %arg5[%c0_8, %c0_9] : memref<24x1xf32, #tpu.memory_space<vmem>>, vector<24x1xf32>
    %9 = vector.broadcast %8 : vector<24x1xf32> to vector<24x648xf32>
    %10 = arith.addf %7, %9 : vector<24x648xf32>
    %cst_10 = arith.constant 0.000000e+00 : f32
    %11 = vector.broadcast %cst_10 : f32 to vector<24x648xf32>
    %12 = arith.maximumf %10, %11 : vector<24x648xf32>
    %c0_11 = arith.constant 0 : index
    %c0_12 = arith.constant 0 : index
    %13 = vector.load %arg6[%c0_11, %c0_12] : memref<24x648xf32, #tpu.memory_space<vmem>>, vector<24x648xf32>
    tpu.vector_store %arg6[%c0_11, %c0_12], %12 {strides = array<i32>} : memref<24x648xf32, #tpu.memory_space<vmem>>, vector<24x648xf32>,
    return
  }
  func.func @transform_0(%arg0: i32) -> (i32, i32) {
    %c0_i32 = arith.constant 0 : i32
    %c0_i32_0 = arith.constant 0 : i32
    %c0_i32_1 = arith.constant 0 : i32
    return %c0_i32, %c0_i32_0 : i32, i32
  }
  func.func @transform_1(%arg0: i32) -> (i32, i32) {
    %c0_i32 = arith.constant 0 : i32
    %c0_i32_0 = arith.constant 0 : i32
    %c0_i32_1 = arith.constant 0 : i32
    return %c0_i32, %c0_i32_0 : i32, i32
  }
  func.func @transform_2(%arg0: i32) -> (i32, i32) {
    %c0_i32 = arith.constant 0 : i32
    %c0_i32_0 = arith.constant 0 : i32
    %c0_i32_1 = arith.constant 0 : i32
    return %c0_i32, %c0_i32_0 : i32, i32
  }
  func.func @transform_3(%arg0: i32) -> (i32, i32) {
    %c0_i32 = arith.constant 0 : i32
    %c0_i32_0 = arith.constant 0 : i32
    %c0_i32_1 = arith.constant 0 : i32
    return %c0_i32, %c0_i32_0 : i32, i32
  }
  func.func @transform_4(%arg0: i32) -> (i32, i32) {
    %c0_i32 = arith.constant 0 : i32
    %c0_i32_0 = arith.constant 0 : i32
    %c0_i32_1 = arith.constant 0 : i32
    return %c0_i32, %c0_i32_0 : i32, i32
  }
  func.func @transform_5(%arg0: i32) -> (i32, i32) {
    %c0_i32 = arith.constant 0 : i32
    %c0_i32_0 = arith.constant 0 : i32
    %c0_i32_1 = arith.constant 0 : i32
    return %c0_i32, %c0_i32_0 : i32, i32
  }
}

module attributes {stable_mosaic.version = 11 : i64} {
  func.func @_conv3_linear_kernel(%arg0: i32, %arg1: memref<216x512xf32, #tpu.memory_space<vmem>>, %arg2: memref<6x216xf32, #tpu.memory_space<vmem>>, %arg3: memref<6x1xf32, #tpu.memory_space<vmem>>, %arg4: memref<6x256x10xf32, #tpu.memory_space<vmem>>, %arg5: memref<1x10xf32, #tpu.memory_space<vmem>>, %arg6: memref<2x10xf32, #tpu.memory_space<vmem>>) attributes {dimension_semantics = [#tpu.dimension_semantics<arbitrary>], iteration_bounds = array<i64: 1>, scalar_prefetch = 0 : i64, scratch_operands = 0 : i64, tpu.core_type = #tpu.core_type<tc>, window_params = [{pipeline_mode = #tpu.pipeline_mode<synchronous>, transform_indices = @transform_0, window_bounds = array<i64: 216, 512>}, {pipeline_mode = #tpu.pipeline_mode<synchronous>, transform_indices = @transform_1, window_bounds = array<i64: 6, 216>}, {pipeline_mode = #tpu.pipeline_mode<synchronous>, transform_indices = @transform_2, window_bounds = array<i64: 6, 1>}, {pipeline_mode = #tpu.pipeline_mode<synchronous>, transform_indices = @transform_3, window_bounds = array<i64: 6, 256, 10>}, {pipeline_mode = #tpu.pipeline_mode<synchronous>, transform_indices = @transform_4, window_bounds = array<i64: 1, 10>}, {pipeline_mode = #tpu.pipeline_mode<synchronous>, transform_indices = @transform_5, window_bounds = array<i64: 2, 10>}]} {
    %c0 = arith.constant 0 : index
    %c0_0 = arith.constant 0 : index
    %0 = vector.load %arg2[%c0, %c0_0] : memref<6x216xf32, #tpu.memory_space<vmem>>, vector<6x216xf32>
    %c0_1 = arith.constant 0 : index
    %c0_2 = arith.constant 0 : index
    %1 = vector.load %arg1[%c0_1, %c0_2] : memref<216x512xf32, #tpu.memory_space<vmem>>, vector<216x512xf32>
    %cst = arith.constant dense<0.000000e+00> : vector<6x512xf32>
    %2 = tpu.matmul %0, %1, %cst {dimension_numbers = #tpu.dot_dimension_numbers<[1], [0], [0], [1], [0, 0, 1, 1], [], []>} : vector<6x216xf32>, vector<216x512xf32>, vector<6x512xf32> -> vector<6x512xf32>
    %c0_3 = arith.constant 0 : index
    %c0_4 = arith.constant 0 : index
    %3 = vector.load %arg3[%c0_3, %c0_4] : memref<6x1xf32, #tpu.memory_space<vmem>>, vector<6x1xf32>
    %4 = vector.broadcast %3 : vector<6x1xf32> to vector<6x512xf32>
    %5 = arith.addf %2, %4 : vector<6x512xf32>
    %c0_5 = arith.constant 0 : index
    %c0_6 = arith.constant 0 : index
    %6 = vector.load %arg5[%c0_5, %c0_6] : memref<1x10xf32, #tpu.memory_space<vmem>>, vector<1x10xf32>
    %7 = vector.extract_strided_slice %5 {offsets = [0, 0], sizes = [1, 256], strides = [1, 1]} : vector<6x512xf32> to vector<1x256xf32>
    %c0_7 = arith.constant 0 : index
    %c0_8 = arith.constant 0 : index
    %c0_9 = arith.constant 0 : index
    %8 = vector.load %arg4[%c0_7, %c0_8, %c0_9] : memref<6x256x10xf32, #tpu.memory_space<vmem>>, vector<1x256x10xf32>
    %9 = vector.shape_cast %8 : vector<1x256x10xf32> to vector<256x10xf32>
    %cst_10 = arith.constant dense<0.000000e+00> : vector<1x10xf32>
    %10 = tpu.matmul %7, %9, %cst_10 {dimension_numbers = #tpu.dot_dimension_numbers<[1], [0], [0], [1], [0, 0, 1, 1], [], []>} : vector<1x256xf32>, vector<256x10xf32>, vector<1x10xf32> -> vector<1x10xf32>
    %11 = arith.addf %6, %10 : vector<1x10xf32>
    %12 = vector.extract_strided_slice %5 {offsets = [1, 0], sizes = [1, 256], strides = [1, 1]} : vector<6x512xf32> to vector<1x256xf32>
    %c1 = arith.constant 1 : index
    %c0_11 = arith.constant 0 : index
    %c0_12 = arith.constant 0 : index
    %13 = vector.load %arg4[%c1, %c0_11, %c0_12] : memref<6x256x10xf32, #tpu.memory_space<vmem>>, vector<1x256x10xf32>
    %14 = vector.shape_cast %13 : vector<1x256x10xf32> to vector<256x10xf32>
    %cst_13 = arith.constant dense<0.000000e+00> : vector<1x10xf32>
    %15 = tpu.matmul %12, %14, %cst_13 {dimension_numbers = #tpu.dot_dimension_numbers<[1], [0], [0], [1], [0, 0, 1, 1], [], []>} : vector<1x256xf32>, vector<256x10xf32>, vector<1x10xf32> -> vector<1x10xf32>
    %16 = arith.addf %11, %15 : vector<1x10xf32>
    %17 = vector.extract_strided_slice %5 {offsets = [2, 0], sizes = [1, 256], strides = [1, 1]} : vector<6x512xf32> to vector<1x256xf32>
    %c2 = arith.constant 2 : index
    %c0_14 = arith.constant 0 : index
    %c0_15 = arith.constant 0 : index
    %18 = vector.load %arg4[%c2, %c0_14, %c0_15] : memref<6x256x10xf32, #tpu.memory_space<vmem>>, vector<1x256x10xf32>
    %19 = vector.shape_cast %18 : vector<1x256x10xf32> to vector<256x10xf32>
    %cst_16 = arith.constant dense<0.000000e+00> : vector<1x10xf32>
    %20 = tpu.matmul %17, %19, %cst_16 {dimension_numbers = #tpu.dot_dimension_numbers<[1], [0], [0], [1], [0, 0, 1, 1], [], []>} : vector<1x256xf32>, vector<256x10xf32>, vector<1x10xf32> -> vector<1x10xf32>
    %21 = arith.addf %16, %20 : vector<1x10xf32>
    %22 = vector.extract_strided_slice %5 {offsets = [3, 0], sizes = [1, 256], strides = [1, 1]} : vector<6x512xf32> to vector<1x256xf32>
    %c3 = arith.constant 3 : index
    %c0_17 = arith.constant 0 : index
    %c0_18 = arith.constant 0 : index
    %23 = vector.load %arg4[%c3, %c0_17, %c0_18] : memref<6x256x10xf32, #tpu.memory_space<vmem>>, vector<1x256x10xf32>
    %24 = vector.shape_cast %23 : vector<1x256x10xf32> to vector<256x10xf32>
    %cst_19 = arith.constant dense<0.000000e+00> : vector<1x10xf32>
    %25 = tpu.matmul %22, %24, %cst_19 {dimension_numbers = #tpu.dot_dimension_numbers<[1], [0], [0], [1], [0, 0, 1, 1], [], []>} : vector<1x256xf32>, vector<256x10xf32>, vector<1x10xf32> -> vector<1x10xf32>
    %26 = arith.addf %21, %25 : vector<1x10xf32>
    %27 = vector.extract_strided_slice %5 {offsets = [4, 0], sizes = [1, 256], strides = [1, 1]} : vector<6x512xf32> to vector<1x256xf32>
    %c4 = arith.constant 4 : index
    %c0_20 = arith.constant 0 : index
    %c0_21 = arith.constant 0 : index
    %28 = vector.load %arg4[%c4, %c0_20, %c0_21] : memref<6x256x10xf32, #tpu.memory_space<vmem>>, vector<1x256x10xf32>
    %29 = vector.shape_cast %28 : vector<1x256x10xf32> to vector<256x10xf32>
    %cst_22 = arith.constant dense<0.000000e+00> : vector<1x10xf32>
    %30 = tpu.matmul %27, %29, %cst_22 {dimension_numbers = #tpu.dot_dimension_numbers<[1], [0], [0], [1], [0, 0, 1, 1], [], []>} : vector<1x256xf32>, vector<256x10xf32>, vector<1x10xf32> -> vector<1x10xf32>
    %31 = arith.addf %26, %30 : vector<1x10xf32>
    %32 = vector.extract_strided_slice %5 {offsets = [5, 0], sizes = [1, 256], strides = [1, 1]} : vector<6x512xf32> to vector<1x256xf32>
    %c5 = arith.constant 5 : index
    %c0_23 = arith.constant 0 : index
    %c0_24 = arith.constant 0 : index
    %33 = vector.load %arg4[%c5, %c0_23, %c0_24] : memref<6x256x10xf32, #tpu.memory_space<vmem>>, vector<1x256x10xf32>
    %34 = vector.shape_cast %33 : vector<1x256x10xf32> to vector<256x10xf32>
    %cst_25 = arith.constant dense<0.000000e+00> : vector<1x10xf32>
    %35 = tpu.matmul %32, %34, %cst_25 {dimension_numbers = #tpu.dot_dimension_numbers<[1], [0], [0], [1], [0, 0, 1, 1], [], []>} : vector<1x256xf32>, vector<256x10xf32>, vector<1x10xf32> -> vector<1x10xf32>
    %36 = arith.addf %31, %35 : vector<1x10xf32>
    %c0_26 = arith.constant 0 : index
    %c0_27 = arith.constant 0 : index
    %37 = vector.load %arg5[%c0_26, %c0_27] : memref<1x10xf32, #tpu.memory_space<vmem>>, vector<1x10xf32>
    %38 = vector.extract_strided_slice %5 {offsets = [0, 256], sizes = [1, 256], strides = [1, 1]} : vector<6x512xf32> to vector<1x256xf32>
    %c0_28 = arith.constant 0 : index
    %c0_29 = arith.constant 0 : index
    %c0_30 = arith.constant 0 : index
    %39 = vector.load %arg4[%c0_28, %c0_29, %c0_30] : memref<6x256x10xf32, #tpu.memory_space<vmem>>, vector<1x256x10xf32>
    %40 = vector.shape_cast %39 : vector<1x256x10xf32> to vector<256x10xf32>
    %cst_31 = arith.constant dense<0.000000e+00> : vector<1x10xf32>
    %41 = tpu.matmul %38, %40, %cst_31 {dimension_numbers = #tpu.dot_dimension_numbers<[1], [0], [0], [1], [0, 0, 1, 1], [], []>} : vector<1x256xf32>, vector<256x10xf32>, vector<1x10xf32> -> vector<1x10xf32>
    %42 = arith.addf %37, %41 : vector<1x10xf32>
    %43 = vector.extract_strided_slice %5 {offsets = [1, 256], sizes = [1, 256], strides = [1, 1]} : vector<6x512xf32> to vector<1x256xf32>
    %c1_32 = arith.constant 1 : index
    %c0_33 = arith.constant 0 : index
    %c0_34 = arith.constant 0 : index
    %44 = vector.load %arg4[%c1_32, %c0_33, %c0_34] : memref<6x256x10xf32, #tpu.memory_space<vmem>>, vector<1x256x10xf32>
    %45 = vector.shape_cast %44 : vector<1x256x10xf32> to vector<256x10xf32>
    %cst_35 = arith.constant dense<0.000000e+00> : vector<1x10xf32>
    %46 = tpu.matmul %43, %45, %cst_35 {dimension_numbers = #tpu.dot_dimension_numbers<[1], [0], [0], [1], [0, 0, 1, 1], [], []>} : vector<1x256xf32>, vector<256x10xf32>, vector<1x10xf32> -> vector<1x10xf32>
    %47 = arith.addf %42, %46 : vector<1x10xf32>
    %48 = vector.extract_strided_slice %5 {offsets = [2, 256], sizes = [1, 256], strides = [1, 1]} : vector<6x512xf32> to vector<1x256xf32>
    %c2_36 = arith.constant 2 : index
    %c0_37 = arith.constant 0 : index
    %c0_38 = arith.constant 0 : index
    %49 = vector.load %arg4[%c2_36, %c0_37, %c0_38] : memref<6x256x10xf32, #tpu.memory_space<vmem>>, vector<1x256x10xf32>
    %50 = vector.shape_cast %49 : vector<1x256x10xf32> to vector<256x10xf32>
    %cst_39 = arith.constant dense<0.000000e+00> : vector<1x10xf32>
    %51 = tpu.matmul %48, %50, %cst_39 {dimension_numbers = #tpu.dot_dimension_numbers<[1], [0], [0], [1], [0, 0, 1, 1], [], []>} : vector<1x256xf32>, vector<256x10xf32>, vector<1x10xf32> -> vector<1x10xf32>
    %52 = arith.addf %47, %51 : vector<1x10xf32>
    %53 = vector.extract_strided_slice %5 {offsets = [3, 256], sizes = [1, 256], strides = [1, 1]} : vector<6x512xf32> to vector<1x256xf32>
    %c3_40 = arith.constant 3 : index
    %c0_41 = arith.constant 0 : index
    %c0_42 = arith.constant 0 : index
    %54 = vector.load %arg4[%c3_40, %c0_41, %c0_42] : memref<6x256x10xf32, #tpu.memory_space<vmem>>, vector<1x256x10xf32>
    %55 = vector.shape_cast %54 : vector<1x256x10xf32> to vector<256x10xf32>
    %cst_43 = arith.constant dense<0.000000e+00> : vector<1x10xf32>
    %56 = tpu.matmul %53, %55, %cst_43 {dimension_numbers = #tpu.dot_dimension_numbers<[1], [0], [0], [1], [0, 0, 1, 1], [], []>} : vector<1x256xf32>, vector<256x10xf32>, vector<1x10xf32> -> vector<1x10xf32>
    %57 = arith.addf %52, %56 : vector<1x10xf32>
    %58 = vector.extract_strided_slice %5 {offsets = [4, 256], sizes = [1, 256], strides = [1, 1]} : vector<6x512xf32> to vector<1x256xf32>
    %c4_44 = arith.constant 4 : index
    %c0_45 = arith.constant 0 : index
    %c0_46 = arith.constant 0 : index
    %59 = vector.load %arg4[%c4_44, %c0_45, %c0_46] : memref<6x256x10xf32, #tpu.memory_space<vmem>>, vector<1x256x10xf32>
    %60 = vector.shape_cast %59 : vector<1x256x10xf32> to vector<256x10xf32>
    %cst_47 = arith.constant dense<0.000000e+00> : vector<1x10xf32>
    %61 = tpu.matmul %58, %60, %cst_47 {dimension_numbers = #tpu.dot_dimension_numbers<[1], [0], [0], [1], [0, 0, 1, 1], [], []>} : vector<1x256xf32>, vector<256x10xf32>, vector<1x10xf32> -> vector<1x10xf32>
    %62 = arith.addf %57, %61 : vector<1x10xf32>
    %63 = vector.extract_strided_slice %5 {offsets = [5, 256], sizes = [1, 256], strides = [1, 1]} : vector<6x512xf32> to vector<1x256xf32>
    %c5_48 = arith.constant 5 : index
    %c0_49 = arith.constant 0 : index
    %c0_50 = arith.constant 0 : index
    %64 = vector.load %arg4[%c5_48, %c0_49, %c0_50] : memref<6x256x10xf32, #tpu.memory_space<vmem>>, vector<1x256x10xf32>
    %65 = vector.shape_cast %64 : vector<1x256x10xf32> to vector<256x10xf32>
    %cst_51 = arith.constant dense<0.000000e+00> : vector<1x10xf32>
    %66 = tpu.matmul %63, %65, %cst_51 {dimension_numbers = #tpu.dot_dimension_numbers<[1], [0], [0], [1], [0, 0, 1, 1], [], []>} : vector<1x256xf32>, vector<256x10xf32>, vector<1x10xf32> -> vector<1x10xf32>
    %67 = arith.addf %62, %66 : vector<1x10xf32>
    %68 = tpu.concatenate %36, %67 in 0 : vector<1x10xf32>, vector<1x10xf32> -> vector<2x10xf32>
    %c0_52 = arith.constant 0 : index
    %c0_53 = arith.constant 0 : index
    %69 = vector.load %arg6[%c0_52, %c0_53] : memref<2x10xf32, #tpu.memory_space<vmem>>, vector<2x10xf32>
    tpu.vector_store %arg6[%c0_52, %c0_53], %68 {strides = array<i32>} : memref<2x10xf32, #tpu.memory_space<vmem>>, vector<2x10xf32>,
    return
  }
  func.func @transform_0(%arg0: i32) -> (i32, i32) {
    %c0_i32 = arith.constant 0 : i32
    %c0_i32_0 = arith.constant 0 : i32
    %c0_i32_1 = arith.constant 0 : i32
    return %c0_i32, %c0_i32_0 : i32, i32
  }
  func.func @transform_1(%arg0: i32) -> (i32, i32) {
    %c0_i32 = arith.constant 0 : i32
    %c0_i32_0 = arith.constant 0 : i32
    %c0_i32_1 = arith.constant 0 : i32
    return %c0_i32, %c0_i32_0 : i32, i32
  }
  func.func @transform_2(%arg0: i32) -> (i32, i32) {
    %c0_i32 = arith.constant 0 : i32
    %c0_i32_0 = arith.constant 0 : i32
    %c0_i32_1 = arith.constant 0 : i32
    return %c0_i32, %c0_i32_0 : i32, i32
  }
  func.func @transform_3(%arg0: i32) -> (i32, i32, i32) {
    %c0_i32 = arith.constant 0 : i32
    %c0_i32_0 = arith.constant 0 : i32
    %c0_i32_1 = arith.constant 0 : i32
    %c0_i32_2 = arith.constant 0 : i32
    return %c0_i32, %c0_i32_0, %c0_i32_1 : i32, i32, i32
  }
  func.func @transform_4(%arg0: i32) -> (i32, i32) {
    %c0_i32 = arith.constant 0 : i32
    %c0_i32_0 = arith.constant 0 : i32
    %c0_i32_1 = arith.constant 0 : i32
    return %c0_i32, %c0_i32_0 : i32, i32
  }
  func.func @transform_5(%arg0: i32) -> (i32, i32) {
    %c0_i32 = arith.constant 0 : i32
    %c0_i32_0 = arith.constant 0 : i32
    %c0_i32_1 = arith.constant 0 : i32
    return %c0_i32, %c0_i32_0 : i32, i32
  }
}

</mosaic_0001>

<bundles_post_ra>
// kernel: depth_cnn_forward.3
= control target key start
LH: loop header
LB: loop body
LE: loop exit
PB: predicated region body
PF: predicated region fallthrough
CT: control target
= control target key end

     0   :  { %vm91_vm0 = vcmask 1040384   ;;  %vm84_vm1 = vcmask 400384   ;;  %v364_v59 = vmov 0   ;;  %vm323_vm2 = vcmask 588800   ;;  %s647_s0 = inlined_call_operand.vmem [shape: f32[49,968], index: 0, kind: input, shape index: {}]   ;;  %s648_s1 = inlined_call_operand.vmem [shape: f32[12,49], index: 1, kind: input, shape index: {}]   ;;  %s649_s2 = inlined_call_operand.vmem [shape: f32[12,1], index: 2, kind: input, shape index: {}]   ;;  %s650_s3 = inlined_call_operand.vmem [shape: f32[12,968], index: 3, kind: output, shape index: {}]  }
   0x1   :  { %v64_v0 = vld [vmem:[%s647_s0 + $0x180] sm:$0x1]  ;;  %v65_v1 = vld [vmem:[%s647_s0 + $0x188] sm:$0x1]  ;;  %v66_v2 = vld [vmem:[%s647_s0 + $0x190] sm:$0x1]  ;;  %363 = vset.pattern.permute.xlu0 %v364_v59 }
   0x2   :  { %338 = vmatpush.msk.msra.mxu0 %vm91_vm0, %v64_v0  ;;  %341 = vmatpush.msk.msra.mxu1 %vm91_vm0, %v65_v1  ;;  %v67_v3 = vld [vmem:[%s647_s0 + $0x198] sm:$0x1]  ;;  %v56_v4 = vld [vmem:[%s647_s0 + $0x140] sm:$0xff]  ;;  %v57_v5 = vld [vmem:[%s647_s0 + $0x148] sm:$0xff]  ;;  %vm332_vm3 = vcmask 584704  }
   0x3   :  { %344 = vmatpush.msk.msra.mxu2 %vm91_vm0, %v66_v2  ;;  %347 = vmatpush.msk.msra.mxu3 %vm91_vm0, %v67_v3  ;;  %v58_v6 = vld [vmem:[%s647_s0 + $0x150] sm:$0xff]  ;;  %v59_v7 = vld [vmem:[%s647_s0 + $0x158] sm:$0xff]  ;;  %v48_v8 = vld [vmem:[%s647_s0 + $0x100] sm:$0xff] }
   0x4   :  { %126 = vmatpush.msra.mxu0 %v56_v4  ;;  %149 = vmatpush.msra.mxu1 %v57_v5  ;;  %v49_v9 = vld [vmem:[%s647_s0 + $0x108] sm:$0xff]  ;;  %v50_v10 = vld [vmem:[%s647_s0 + $0x110] sm:$0xff]  ;;  %v51_v11 = vld [vmem:[%s647_s0 + $0x118] sm:$0xff] }
   0x5   :  { %172 = vmatpush.msra.mxu2 %v58_v6  ;;  %195 = vmatpush.msra.mxu3 %v59_v7  ;;  %v40_v12 = vld [vmem:[%s647_s0 + $0xc0] sm:$0xff]  ;;  %v41_v13 = vld [vmem:[%s647_s0 + $0xc8] sm:$0xff]  ;;  %v42_v14 = vld [vmem:[%s647_s0 + $0xd0] sm:$0xff] }
   0x6   :  { %127 = vmatpush.msra.mxu0 %v48_v8  ;;  %150 = vmatpush.msra.mxu1 %v49_v9  ;;  %v43_v15 = vld [vmem:[%s647_s0 + $0xd8] sm:$0xff]  ;;  %v32_v16 = vld [vmem:[%s647_s0 + $0x80] sm:$0xff]  ;;  %v33_v17 = vld [vmem:[%s647_s0 + $0x88] sm:$0xff] }
   0x7   :  { %173 = vmatpush.msra.mxu2 %v50_v10  ;;  %196 = vmatpush.msra.mxu3 %v51_v11  ;;  %v34_v18 = vld [vmem:[%s647_s0 + $0x90] sm:$0xff]  ;;  %v35_v19 = vld [vmem:[%s647_s0 + $0x98] sm:$0xff]  ;;  %v24_v20 = vld [vmem:[%s647_s0 + $0x40] sm:$0xff] }
   0x8   :  { %128 = vmatpush.msra.mxu0 %v40_v12  ;;  %151 = vmatpush.msra.mxu1 %v41_v13  ;;  %v25_v21 = vld [vmem:[%s647_s0 + $0x48] sm:$0xff]  ;;  %v26_v22 = vld [vmem:[%s647_s0 + $0x50] sm:$0xff]  ;;  %v27_v23 = vld [vmem:[%s647_s0 + $0x58] sm:$0xff] }
   0x9   :  { %174 = vmatpush.msra.mxu2 %v42_v14  ;;  %197 = vmatpush.msra.mxu3 %v43_v15  ;;  %v16_v24 = vld [vmem:[%s647_s0] sm:$0xff]  ;;  %v17_v25 = vld [vmem:[%s647_s0 + $0x8] sm:$0xff]  ;;  %v18_v26 = vld [vmem:[%s647_s0 + $0x10] sm:$0xff] }
   0xa   :  { %129 = vmatpush.msra.mxu0 %v32_v16  ;;  %152 = vmatpush.msra.mxu1 %v33_v17  ;;  %v19_v27 = vld [vmem:[%s647_s0 + $0x18] sm:$0xff]  ;;  %v476_v28 = vld [vmem:[%s648_s1] sm:$0xff]  ;;  %v70_v29 = vld [vmem:[%s647_s0 + $0x1b0] sm:$0x1] }
   0xb   :  { %175 = vmatpush.msra.mxu2 %v34_v18  ;;  %198 = vmatpush.msra.mxu3 %v35_v19  ;;  %v71_v30 = vld [vmem:[%s647_s0 + $0x1b8] sm:$0x1]  ;;  %v68_v31 = vld [vmem:[%s647_s0 + $0x1a0] sm:$0x1]  ;;  %v69_v32 = vld [vmem:[%s647_s0 + $0x1a8] sm:$0x1] }
   0xc   :  { %130 = vmatpush.msra.mxu0 %v24_v20  ;;  %153 = vmatpush.msra.mxu1 %v25_v21  ;;  %v62_v33 = vld [vmem:[%s647_s0 + $0x170] sm:$0xff]  ;;  %v63_v34 = vld [vmem:[%s647_s0 + $0x178] sm:$0xff]  ;;  %v60_v35 = vld [vmem:[%s647_s0 + $0x160] sm:$0xff] }
   0xd   :  { %176 = vmatpush.msra.mxu2 %v26_v22  ;;  %199 = vmatpush.msra.mxu3 %v27_v23  ;;  %v61_v36 = vld [vmem:[%s647_s0 + $0x168] sm:$0xff]  ;;  %v54_v37 = vld [vmem:[%s647_s0 + $0x130] sm:$0xff]  ;;  %v55_v38 = vld [vmem:[%s647_s0 + $0x138] sm:$0xff] }
   0xe   :  { %131 = vmatpush.msra.mxu0 %v16_v24  ;;  %154 = vmatpush.msra.mxu1 %v17_v25  ;;  %v52_v39 = vld [vmem:[%s647_s0 + $0x120] sm:$0xff]  ;;  %v53_v40 = vld [vmem:[%s647_s0 + $0x128] sm:$0xff]  ;;  %v46_v41 = vld [vmem:[%s647_s0 + $0xf0] sm:$0xff] }
   0xf   :  { %177 = vmatpush.msra.mxu2 %v18_v26  ;;  %200 = vmatpush.msra.mxu3 %v19_v27  ;;  %v47_v42 = vld [vmem:[%s647_s0 + $0xf8] sm:$0xff]  ;;  %v15_v43 = vld [vmem:[%s648_s1 + $0x8] sm:$0xf]  ;;  %v44_v44 = vld [vmem:[%s647_s0 + $0xe0] sm:$0xff] }
  0x10   :  { %339 = vmatmul.msk.f32.vlgmr.msra.gmra.mxu0 %vm84_vm1, %v476_v28  ;;  %342 = vmatmul.msk.f32.vlgmr.msra.gmra.mxu1 %vm84_vm1, %v476_v28  ;;  %v45_v45 = vld [vmem:[%s647_s0 + $0xe8] sm:$0xff]  ;;  %v38_v46 = vld [vmem:[%s647_s0 + $0xb0] sm:$0xff]  ;;  %v39_v47 = vld [vmem:[%s647_s0 + $0xb8] sm:$0xff] }
  0x11   :  { %345 = vmatmul.msk.f32.vlgmr.msra.gmra.mxu2 %vm84_vm1, %v476_v28  ;;  %348 = vmatmul.msk.f32.vlgmr.msra.gmra.mxu3 %vm84_vm1, %v476_v28  ;;  %v36_v48 = vld [vmem:[%s647_s0 + $0xa0] sm:$0xff]  ;;  %v37_v49 = vld [vmem:[%s647_s0 + $0xa8] sm:$0xff]  ;;  %v30_v50 = vld [vmem:[%s647_s0 + $0x70] sm:$0xff] }
  0x12   :  { %356 = vmatpush.msk.msrb.mxu2 %vm91_vm0, %v70_v29  ;;  %359 = vmatpush.msk.msrb.mxu3 %vm91_vm0, %v71_v30  ;;  %v31_v51 = vld [vmem:[%s647_s0 + $0x78] sm:$0xff]  ;;  %v28_v52 = vld [vmem:[%s647_s0 + $0x60] sm:$0xff]  ;;  %v29_v53 = vld [vmem:[%s647_s0 + $0x68] sm:$0xff] }
  0x13   :  { %350 = vmatpush.msk.msrb.mxu0 %vm91_vm0, %v68_v31  ;;  %353 = vmatpush.msk.msrb.mxu1 %vm91_vm0, %v69_v32  ;;  %v22_v54 = vld [vmem:[%s647_s0 + $0x30] sm:$0xff]  ;;  %v23_v55 = vld [vmem:[%s647_s0 + $0x38] sm:$0xff]  ;;  %v20_v56 = vld [vmem:[%s647_s0 + $0x20] sm:$0xff] }
  0x14   :  { %264 = vmatpush.msrb.mxu2 %v62_v33  ;;  %287 = vmatpush.msrb.mxu3 %v63_v34  ;;  %v21_v57 = vld [vmem:[%s647_s0 + $0x28] sm:$0xff]  ;;  %v72_v58 = vld [vmem:[%s649_s2] sm:$0xff] }
  0x15   :  { %218 = vmatpush.msrb.mxu0 %v60_v35  ;;  %241 = vmatpush.msrb.mxu1 %v61_v36  ;;  %v73_v60 = vld [vmem:[%s649_s2 + $0x8] sm:$0xf] }
  0x16   :  { %265 = vmatpush.msrb.mxu2 %v54_v37  ;;  %288 = vmatpush.msrb.mxu3 %v55_v38 }
  0x17   :  { %219 = vmatpush.msrb.mxu0 %v52_v39  ;;  %242 = vmatpush.msrb.mxu1 %v53_v40 }
  0x18   :  { %266 = vmatpush.msrb.mxu2 %v46_v41  ;;  %289 = vmatpush.msrb.mxu3 %v47_v42 }
  0x19   :  { %340 = vmatmul.msk.f32.gmra.mxu0 %vm84_vm1, %v15_v43  ;;  %343 = vmatmul.msk.f32.gmra.mxu1 %vm84_vm1, %v15_v43 }
  0x1a   :  { %346 = vmatmul.msk.f32.gmra.mxu2 %vm84_vm1, %v15_v43  ;;  %349 = vmatmul.msk.f32.gmra.mxu3 %vm84_vm1, %v15_v43 }
  0x1b   :  { %220 = vmatpush.msrb.mxu0 %v44_v44  ;;  %243 = vmatpush.msrb.mxu1 %v45_v45 }
  0x1c   :  { %267 = vmatpush.msrb.mxu2 %v38_v46  ;;  %290 = vmatpush.msrb.mxu3 %v39_v47 }
  0x1d   :  { %221 = vmatpush.msrb.mxu0 %v36_v48  ;;  %244 = vmatpush.msrb.mxu1 %v37_v49 }
  0x1e   :  { %268 = vmatpush.msrb.mxu2 %v30_v50  ;;  %291 = vmatpush.msrb.mxu3 %v31_v51 }
  0x1f   :  { %222 = vmatpush.msrb.mxu0 %v28_v52  ;;  %245 = vmatpush.msrb.mxu1 %v29_v53 }
  0x20   :  { %269 = vmatpush.msrb.mxu2 %v22_v54  ;;  %292 = vmatpush.msrb.mxu3 %v23_v55 }
  0x21   :  { %223 = vmatpush.msrb.mxu0 %v20_v56  ;;  %246 = vmatpush.msrb.mxu1 %v21_v57 }
  0x22   :  { %351 = vmatmul.msk.f32.vlgmr.msrb.gmra.mxu0 %vm84_vm1, %v476_v28  ;;  %354 = vmatmul.msk.f32.vlgmr.msrb.gmra.mxu1 %vm84_vm1, %v476_v28 }
  0x23   :  { %357 = vmatmul.msk.f32.vlgmr.msrb.gmra.mxu2 %vm84_vm1, %v476_v28  ;;  %360 = vmatmul.msk.f32.vlgmr.msrb.gmra.mxu3 %vm84_vm1, %v476_v28 }
  0x24   :  { %76 = vperm.xlu0 %363, %v72_v58  }
  0x2a   :  { %352 = vmatmul.msk.f32.gmra.mxu0 %vm84_vm1, %v15_v43  ;;  %355 = vmatmul.msk.f32.gmra.mxu1 %vm84_vm1, %v15_v43 }
  0x2b   :  { %358 = vmatmul.msk.f32.gmra.mxu2 %vm84_vm1, %v15_v43  ;;  %361 = vmatmul.msk.f32.gmra.mxu3 %vm84_vm1, %v15_v43 }
  0x2c   :  { %81 = vperm.xlu0 %363, %v73_v60  }
  0x8d   :  { %v133_v61 = vpop.f32.mrf.mxu0  ;;  %v156_v62 = vpop.f32.mrf.mxu1 }
  0x94   :  { %v179_v63 = vpop.f32.mrf.mxu2  ;;  %v202_v0 = vpop.f32.mrf.mxu3 }
  0x96   :  { %v77_v1 = vpop.permute.xlu0 %76  ;;  %v136_v2 = vpop.f32.mrf.mxu0 }
  0x97   :  { %v134_v3 = vadd.f32 %v133_v61, %v77_v1  ;;  %v157_v4 = vadd.f32 %v156_v62, %v77_v1  ;;  %v180_v5 = vadd.f32 %v179_v63, %v77_v1  ;;  %v203_v6 = vadd.f32 %v202_v0, %v77_v1  ;;  %v159_v7 = vpop.f32.mrf.mxu1 }
  0x99   :  { %v300_v8 = vmax.f32 %v134_v3, 0.0  ;;  %v301_v9 = vmax.f32 %v157_v4, 0.0  ;;  %v302_v10 = vmax.f32 %v180_v5, 0.0  ;;  %v303_v11 = vmax.f32 %v203_v6, 0.0 }
  0x9b   :  { %316 = vst [vmem:[%s650_s3] sm:$0xff] %v300_v8 }
  0x9c   :  { %317 = vst [vmem:[%s650_s3 + $0x8] sm:$0xff] %v301_v9 }
  0x9d   :  { %318 = vst [vmem:[%s650_s3 + $0x10] sm:$0xff] %v302_v10  ;;  %v182_v12 = vpop.f32.mrf.mxu2  ;;  %v205_v13 = vpop.f32.mrf.mxu3 }
  0x9e   :  { %319 = vst [vmem:[%s650_s3 + $0x18] sm:$0xff] %v303_v11  ;;  %v82_v14 = vpop.permute.xlu0 %81 }
  0x9f   :  { %v137_v15 = vadd.f32 %v136_v2, %v82_v14  ;;  %v160_v16 = vadd.f32 %v159_v7, %v82_v14  ;;  %v183_v17 = vadd.f32 %v182_v12, %v82_v14  ;;  %v206_v18 = vadd.f32 %v205_v13, %v82_v14  ;;  %v225_v19 = vpop.f32.mrf.mxu0  ;;  %v248_v21 = vpop.f32.mrf.mxu1 }
  0xa0   :  { %v226_v20 = vadd.f32 %v225_v19, %v77_v1  ;;  %v249_v26 = vadd.f32 %v248_v21, %v77_v1 }
  0xa1   :  { %v308_v22 = vmax.f32 %v137_v15, 0.0  ;;  %v309_v23 = vmax.f32 %v160_v16, 0.0  ;;  %v310_v24 = vmax.f32 %v183_v17, 0.0  ;;  %v311_v25 = vmax.f32 %v206_v18, 0.0 }
  0xa2   :  { %v304_v27 = vmax.f32 %v226_v20, 0.0  ;;  %v305_v28 = vmax.f32 %v249_v26, 0.0 }
  0xa3   :  { %325 = vst [vmem:[%s650_s3 + $0x40] sm:$0xf] %v308_v22 }
  0xa4   :  { %326 = vst [vmem:[%s650_s3 + $0x48] sm:$0xf] %v309_v23 }
  0xa5   :  { %327 = vst [vmem:[%s650_s3 + $0x50] sm:$0xf] %v310_v24 }
  0xa6   :  { %328 = vst [vmem:[%s650_s3 + $0x58] sm:$0xf] %v311_v25  ;;  %v271_v29 = vpop.f32.mrf.mxu2  ;;  %v294_v31 = vpop.f32.mrf.mxu3 }
  0xa7   :  { %320 = vst [vmem:[%s650_s3 + $0x20] sm:$0xff] %v304_v27  ;;  %v272_v30 = vadd.f32 %v271_v29, %v77_v1  ;;  %v228_v32 = vpop.f32.mrf.mxu0  ;;  %v295_v33 = vadd.f32 %v294_v31, %v77_v1  ;;  %v251_v35 = vpop.f32.mrf.mxu1 }
  0xa8   :  { %321 = vst [vmem:[%s650_s3 + $0x28] sm:$0xff] %v305_v28  ;;  %v229_v34 = vadd.f32 %v228_v32, %v82_v14  ;;  %v252_v37 = vadd.f32 %v251_v35, %v82_v14 }
  0xa9   :  { %v306_v36 = vmax.f32 %v272_v30, 0.0  ;;  %v307_v38 = vmax.f32 %v295_v33, 0.0 }
  0xaa   :  { %v312_v39 = vmax.f32 %v229_v34, 0.0  ;;  %v313_v40 = vmax.f32 %v252_v37, 0.0 }
  0xab   :  { %322 = vst [vmem:[%s650_s3 + $0x30] sm:$0xff] %v306_v36 }
  0xac   :  { %324 = vst.msk [vmem:[%s650_s3 + $0x38] sm:$0xff] %vm323_vm2, %v307_v38 }
  0xad   :  { %329 = vst [vmem:[%s650_s3 + $0x60] sm:$0xf] %v312_v39 }
  0xae   :  { %330 = vst [vmem:[%s650_s3 + $0x68] sm:$0xf] %v313_v40  ;;  %v274_v41 = vpop.f32.mrf.mxu2  ;;  %v297_v43 = vpop.f32.mrf.mxu3 }
  0xaf   :  { %v275_v42 = vadd.f32 %v274_v41, %v82_v14  ;;  %v298_v44 = vadd.f32 %v297_v43, %v82_v14 }
  0xb1   :  { %v314_v45 = vmax.f32 %v275_v42, 0.0  ;;  %v315_v46 = vmax.f32 %v298_v44, 0.0 }
  0xb3   :  { %331 = vst [vmem:[%s650_s3 + $0x70] sm:$0xf] %v314_v45 }
  0xb4   :  { %333 = vst.msk [vmem:[%s650_s3 + $0x78] sm:$0xf] %vm332_vm3, %v315_v46 }

// kernel: depth_cnn_forward.4
= control target key start
LH: loop header
LB: loop body
LE: loop exit
PB: predicated region body
PF: predicated region fallthrough
CT: control target
= control target key end

     0   :  { %vm125_vm0 = vcmask 1043456   ;;  %v574_v3 = vmov 0   ;;  %vm118_vm1 = vcmask 883712   ;;  %vm303_vm2 = vcmask 97280   ;;  %s997_s0 = inlined_call_operand.vmem [shape: f32[108,648], index: 0, kind: input, shape index: {}]   ;;  %s998_s1 = inlined_call_operand.vmem [shape: f32[12,108], index: 1, kind: input, shape index: {}]   ;;  %s999_s2 = inlined_call_operand.vmem [shape: f32[12,1], index: 2, kind: input, shape index: {}]   ;;  %s1000_s4 = inlined_call_operand.vmem [shape: f32[24,1], index: 4, kind: input, shape index: {}]   ;;  %s1001_s3 = inlined_call_operand.vmem [shape: f32[24,12], index: 3, kind: input, shape index: {}]   ;;  %s1002_s5 = inlined_call_operand.vmem [shape: f32[24,648], index: 5, kind: output, shape index: {}]  }
   0x1   :  { %v100_v0 = vld [vmem:[%s997_s0 + $0x270] sm:$0xf]  ;;  %v101_v1 = vld [vmem:[%s997_s0 + $0x278] sm:$0xf]  ;;  %v102_v2 = vld [vmem:[%s997_s0 + $0x280] sm:$0xf]  ;;  %571 = vset.pattern.permute.xlu0 %v574_v3  ;;  %572 = vset.pattern.permute.xlu1 %v574_v3 }
   0x2   :  { %528 = vmatpush.msk.msra.mxu0 %vm125_vm0, %v100_v0  ;;  %531 = vmatpush.msk.msra.mxu1 %vm125_vm0, %v101_v1  ;;  %v103_v4 = vld [vmem:[%s997_s0 + $0x288] sm:$0xf]  ;;  %v94_v5 = vld [vmem:[%s997_s0 + $0x240] sm:$0xff]  ;;  %v96_v7 = vld [vmem:[%s997_s0 + $0x250] sm:$0xff]  ;;  %vm510_vm3 = vcmask 64512  }
   0x3   :  { %v95_v6 = vld [vmem:[%s997_s0 + $0x248] sm:$0xff]  ;;  %534 = vmatpush.msk.msra.mxu2 %vm125_vm0, %v102_v2  ;;  %537 = vmatpush.msk.msra.mxu3 %vm125_vm0, %v103_v4  ;;  %v97_v8 = vld [vmem:[%s997_s0 + $0x258] sm:$0xff]  ;;  %v88_v9 = vld [vmem:[%s997_s0 + $0x210] sm:$0xff] }
   0x4   :  { %147 = vmatpush.msra.mxu0 %v94_v5  ;;  %170 = vmatpush.msra.mxu1 %v95_v6  ;;  %v89_v10 = vld [vmem:[%s997_s0 + $0x218] sm:$0xff]  ;;  %v90_v11 = vld [vmem:[%s997_s0 + $0x220] sm:$0xff]  ;;  %v91_v12 = vld [vmem:[%s997_s0 + $0x228] sm:$0xff] }
   0x5   :  { %193 = vmatpush.msra.mxu2 %v96_v7  ;;  %216 = vmatpush.msra.mxu3 %v97_v8  ;;  %v82_v13 = vld [vmem:[%s997_s0 + $0x1e0] sm:$0xff]  ;;  %v83_v14 = vld [vmem:[%s997_s0 + $0x1e8] sm:$0xff]  ;;  %v84_v15 = vld [vmem:[%s997_s0 + $0x1f0] sm:$0xff] }
   0x6   :  { %148 = vmatpush.msra.mxu0 %v88_v9  ;;  %171 = vmatpush.msra.mxu1 %v89_v10  ;;  %v85_v16 = vld [vmem:[%s997_s0 + $0x1f8] sm:$0xff]  ;;  %v76_v17 = vld [vmem:[%s997_s0 + $0x1b0] sm:$0xff]  ;;  %v78_v19 = vld [vmem:[%s997_s0 + $0x1c0] sm:$0xff] }
   0x7   :  { %194 = vmatpush.msra.mxu2 %v90_v11  ;;  %217 = vmatpush.msra.mxu3 %v91_v12  ;;  %v77_v18 = vld [vmem:[%s997_s0 + $0x1b8] sm:$0xff]  ;;  %v79_v20 = vld [vmem:[%s997_s0 + $0x1c8] sm:$0xff]  ;;  %v70_v21 = vld [vmem:[%s997_s0 + $0x180] sm:$0xff] }
   0x8   :  { %149 = vmatpush.msra.mxu0 %v82_v13  ;;  %172 = vmatpush.msra.mxu1 %v83_v14  ;;  %v71_v22 = vld [vmem:[%s997_s0 + $0x188] sm:$0xff]  ;;  %v72_v23 = vld [vmem:[%s997_s0 + $0x190] sm:$0xff]  ;;  %v73_v24 = vld [vmem:[%s997_s0 + $0x198] sm:$0xff] }
   0x9   :  { %195 = vmatpush.msra.mxu2 %v84_v15  ;;  %218 = vmatpush.msra.mxu3 %v85_v16  ;;  %v64_v25 = vld [vmem:[%s997_s0 + $0x150] sm:$0xff]  ;;  %v65_v26 = vld [vmem:[%s997_s0 + $0x158] sm:$0xff]  ;;  %v66_v27 = vld [vmem:[%s997_s0 + $0x160] sm:$0xff] }
   0xa   :  { %150 = vmatpush.msra.mxu0 %v76_v17  ;;  %173 = vmatpush.msra.mxu1 %v77_v18  ;;  %v67_v28 = vld [vmem:[%s997_s0 + $0x168] sm:$0xff]  ;;  %v58_v29 = vld [vmem:[%s997_s0 + $0x120] sm:$0xff]  ;;  %v60_v31 = vld [vmem:[%s997_s0 + $0x130] sm:$0xff] }
   0xb   :  { %196 = vmatpush.msra.mxu2 %v78_v19  ;;  %219 = vmatpush.msra.mxu3 %v79_v20  ;;  %v59_v30 = vld [vmem:[%s997_s0 + $0x128] sm:$0xff]  ;;  %v61_v32 = vld [vmem:[%s997_s0 + $0x138] sm:$0xff]  ;;  %v52_v33 = vld [vmem:[%s997_s0 + $0xf0] sm:$0xff] }
   0xc   :  { %151 = vmatpush.msra.mxu0 %v70_v21  ;;  %174 = vmatpush.msra.mxu1 %v71_v22  ;;  %v53_v34 = vld [vmem:[%s997_s0 + $0xf8] sm:$0xff]  ;;  %v54_v35 = vld [vmem:[%s997_s0 + $0x100] sm:$0xff]  ;;  %v55_v36 = vld [vmem:[%s997_s0 + $0x108] sm:$0xff] }
   0xd   :  { %197 = vmatpush.msra.mxu2 %v72_v23  ;;  %220 = vmatpush.msra.mxu3 %v73_v24  ;;  %v46_v37 = vld [vmem:[%s997_s0 + $0xc0] sm:$0xff]  ;;  %v47_v38 = vld [vmem:[%s997_s0 + $0xc8] sm:$0xff]  ;;  %v48_v39 = vld [vmem:[%s997_s0 + $0xd0] sm:$0xff] }
   0xe   :  { %152 = vmatpush.msra.mxu0 %v64_v25  ;;  %175 = vmatpush.msra.mxu1 %v65_v26  ;;  %v49_v40 = vld [vmem:[%s997_s0 + $0xd8] sm:$0xff]  ;;  %v40_v41 = vld [vmem:[%s997_s0 + $0x90] sm:$0xff]  ;;  %v42_v43 = vld [vmem:[%s997_s0 + $0xa0] sm:$0xff] }
   0xf   :  { %198 = vmatpush.msra.mxu2 %v66_v27  ;;  %221 = vmatpush.msra.mxu3 %v67_v28  ;;  %v41_v42 = vld [vmem:[%s997_s0 + $0x98] sm:$0xff]  ;;  %v43_v44 = vld [vmem:[%s997_s0 + $0xa8] sm:$0xff]  ;;  %v34_v45 = vld [vmem:[%s997_s0 + $0x60] sm:$0xff] }
  0x10   :  { %153 = vmatpush.msra.mxu0 %v58_v29  ;;  %176 = vmatpush.msra.mxu1 %v59_v30  ;;  %v35_v46 = vld [vmem:[%s997_s0 + $0x68] sm:$0xff]  ;;  %v36_v47 = vld [vmem:[%s997_s0 + $0x70] sm:$0xff]  ;;  %v37_v48 = vld [vmem:[%s997_s0 + $0x78] sm:$0xff] }
  0x11   :  { %199 = vmatpush.msra.mxu2 %v60_v31  ;;  %222 = vmatpush.msra.mxu3 %v61_v32  ;;  %v28_v49 = vld [vmem:[%s997_s0 + $0x30] sm:$0xff]  ;;  %v29_v50 = vld [vmem:[%s997_s0 + $0x38] sm:$0xff]  ;;  %v30_v51 = vld [vmem:[%s997_s0 + $0x40] sm:$0xff] }
  0x12   :  { %154 = vmatpush.msra.mxu0 %v52_v33  ;;  %177 = vmatpush.msra.mxu1 %v53_v34  ;;  %v31_v52 = vld [vmem:[%s997_s0 + $0x48] sm:$0xff]  ;;  %v22_v53 = vld [vmem:[%s997_s0] sm:$0xff]  ;;  %v24_v55 = vld [vmem:[%s997_s0 + $0x10] sm:$0xff] }
  0x13   :  { %200 = vmatpush.msra.mxu2 %v54_v35  ;;  %223 = vmatpush.msra.mxu3 %v55_v36  ;;  %v23_v54 = vld [vmem:[%s997_s0 + $0x8] sm:$0xff]  ;;  %v25_v56 = vld [vmem:[%s997_s0 + $0x18] sm:$0xff]  ;;  %v782_v57 = vld [vmem:[%s998_s1] sm:$0xff] }
  0x14   :  { %155 = vmatpush.msra.mxu0 %v46_v37  ;;  %178 = vmatpush.msra.mxu1 %v47_v38  ;;  %v104_v58 = vld [vmem:[%s997_s0 + $0x290] sm:$0xf]  ;;  %v105_v59 = vld [vmem:[%s997_s0 + $0x298] sm:$0xf]  ;;  %v107_v60 = vld [vmem:[%s999_s2 + $0x8] sm:$0xf] }
  0x15   :  { %201 = vmatpush.msra.mxu2 %v48_v39  ;;  %224 = vmatpush.msra.mxu3 %v49_v40  ;;  %v98_v61 = vld [vmem:[%s997_s0 + $0x260] sm:$0xff]  ;;  %v99_v62 = vld [vmem:[%s997_s0 + $0x268] sm:$0xff]  ;;  %v92_v63 = vld [vmem:[%s997_s0 + $0x230] sm:$0xff] }
  0x16   :  { %156 = vmatpush.msra.mxu0 %v40_v41  ;;  %179 = vmatpush.msra.mxu1 %v41_v42  ;;  %v93_v0 = vld [vmem:[%s997_s0 + $0x238] sm:$0xff]  ;;  %v86_v1 = vld [vmem:[%s997_s0 + $0x200] sm:$0xff]  ;;  %v87_v2 = vld [vmem:[%s997_s0 + $0x208] sm:$0xff] }
  0x17   :  { %202 = vmatpush.msra.mxu2 %v42_v43  ;;  %225 = vmatpush.msra.mxu3 %v43_v44  ;;  %v21_v4 = vld [vmem:[%s998_s1 + $0x8] sm:$0xf]  ;;  %v81_v5 = vld [vmem:[%s997_s0 + $0x1d8] sm:$0xff]  ;;  %v106_v6 = vld [vmem:[%s999_s2] sm:$0xff] }
  0x18   :  { %157 = vmatpush.msra.mxu0 %v34_v45  ;;  %180 = vmatpush.msra.mxu1 %v35_v46  ;;  %v74_v7 = vld [vmem:[%s997_s0 + $0x1a0] sm:$0xff]  ;;  %v75_v8 = vld [vmem:[%s997_s0 + $0x1a8] sm:$0xff]  ;;  %v68_v9 = vld [vmem:[%s997_s0 + $0x170] sm:$0xff] }
  0x19   :  { %203 = vmatpush.msra.mxu2 %v36_v47  ;;  %226 = vmatpush.msra.mxu3 %v37_v48  ;;  %v69_v10 = vld [vmem:[%s997_s0 + $0x178] sm:$0xff]  ;;  %v62_v11 = vld [vmem:[%s997_s0 + $0x140] sm:$0xff]  ;;  %v63_v12 = vld [vmem:[%s997_s0 + $0x148] sm:$0xff] }
  0x1a   :  { %158 = vmatpush.msra.mxu0 %v28_v49  ;;  %181 = vmatpush.msra.mxu1 %v29_v50  ;;  %v56_v13 = vld [vmem:[%s997_s0 + $0x110] sm:$0xff]  ;;  %v57_v14 = vld [vmem:[%s997_s0 + $0x118] sm:$0xff]  ;;  %v50_v15 = vld [vmem:[%s997_s0 + $0xe0] sm:$0xff] }
  0x1b   :  { %204 = vmatpush.msra.mxu2 %v30_v51  ;;  %227 = vmatpush.msra.mxu3 %v31_v52  ;;  %v51_v16 = vld [vmem:[%s997_s0 + $0xe8] sm:$0xff]  ;;  %v44_v17 = vld [vmem:[%s997_s0 + $0xb0] sm:$0xff]  ;;  %v45_v18 = vld [vmem:[%s997_s0 + $0xb8] sm:$0xff] }
  0x1c   :  { %159 = vmatpush.msra.mxu0 %v22_v53  ;;  %182 = vmatpush.msra.mxu1 %v23_v54  ;;  %v38_v19 = vld [vmem:[%s997_s0 + $0x80] sm:$0xff]  ;;  %v39_v20 = vld [vmem:[%s997_s0 + $0x88] sm:$0xff]  ;;  %v32_v21 = vld [vmem:[%s997_s0 + $0x50] sm:$0xff] }
  0x1d   :  { %205 = vmatpush.msra.mxu2 %v24_v55  ;;  %228 = vmatpush.msra.mxu3 %v25_v56  ;;  %v33_v22 = vld [vmem:[%s997_s0 + $0x58] sm:$0xff]  ;;  %v26_v23 = vld [vmem:[%s997_s0 + $0x20] sm:$0xff]  ;;  %v27_v24 = vld [vmem:[%s997_s0 + $0x28] sm:$0xff] }
  0x1e   :  { %529 = vmatmul.msk.f32.vlgmr.msra.gmra.mxu0 %vm118_vm1, %v782_v57  ;;  %532 = vmatmul.msk.f32.vlgmr.msra.gmra.mxu1 %vm118_vm1, %v782_v57  ;;  %v285_v28 = vld [vmem:[%s1000_s4] sm:$0xff]  ;;  %v286_v34 = vld [vmem:[%s1000_s4 + $0x8] sm:$0xff]  ;;  %v284_v47 = vld [vmem:[%s1001_s3 + $0x10] sm:$0xff] }
  0x1f   :  { %535 = vmatmul.msk.f32.vlgmr.msra.gmra.mxu2 %vm118_vm1, %v782_v57  ;;  %538 = vmatmul.msk.f32.vlgmr.msra.gmra.mxu3 %vm118_vm1, %v782_v57  ;;  %v282_v39 = vld [vmem:[%s1001_s3] sm:$0xff]  ;;  %v283_v46 = vld [vmem:[%s1001_s3 + $0x8] sm:$0xff]  ;;  %v287_v48 = vld [vmem:[%s1000_s4 + $0x10] sm:$0xff] }
  0x20   :  { %540 = vmatpush.msk.msrb.mxu0 %vm125_vm0, %v104_v58  ;;  %543 = vmatpush.msk.msrb.mxu1 %vm125_vm0, %v105_v59 }
  0x21   :  { %115 = vperm.xlu0 %571, %v107_v60   ;;  %573 = vset.pattern.permute.xlu2 %v574_v3  ;;  %v80_v3 = vld [vmem:[%s997_s0 + $0x1d0] sm:$0xff] }
  0x22   :  { %239 = vmatpush.msrb.mxu0 %v98_v61  ;;  %262 = vmatpush.msrb.mxu1 %v99_v62 }
  0x23   :  { %290 = vperm.xlu1 %572, %v285_v28   ;;  %300 = vperm.xlu2 %573, %v287_v48  }
  0x24   :  { %240 = vmatpush.msrb.mxu0 %v92_v63  ;;  %263 = vmatpush.msrb.mxu1 %v93_v0 }
  0x26   :  { %241 = vmatpush.msrb.mxu0 %v86_v1  ;;  %264 = vmatpush.msrb.mxu1 %v87_v2 }
  0x27   :  { %530 = vmatmul.msk.f32.gmra.mxu0 %vm118_vm1, %v21_v4  ;;  %533 = vmatmul.msk.f32.gmra.mxu1 %vm118_vm1, %v21_v4 }
  0x28   :  { %536 = vmatmul.msk.f32.gmra.mxu2 %vm118_vm1, %v21_v4  ;;  %539 = vmatmul.msk.f32.gmra.mxu3 %vm118_vm1, %v21_v4 }
  0x29   :  { %242 = vmatpush.msrb.mxu0 %v80_v3  ;;  %265 = vmatpush.msrb.mxu1 %v81_v5 }
  0x2a   :  { %110 = vperm.xlu0 %571, %v106_v6  }
  0x2b   :  { %243 = vmatpush.msrb.mxu0 %v74_v7  ;;  %266 = vmatpush.msrb.mxu1 %v75_v8 }
  0x2c   :  { %295 = vperm.xlu1 %572, %v286_v34  }
  0x2d   :  { %244 = vmatpush.msrb.mxu0 %v68_v9  ;;  %267 = vmatpush.msrb.mxu1 %v69_v10 }
  0x2f   :  { %245 = vmatpush.msrb.mxu0 %v62_v11  ;;  %268 = vmatpush.msrb.mxu1 %v63_v12 }
  0x31   :  { %246 = vmatpush.msrb.mxu0 %v56_v13  ;;  %269 = vmatpush.msrb.mxu1 %v57_v14 }
  0x33   :  { %247 = vmatpush.msrb.mxu0 %v50_v15  ;;  %270 = vmatpush.msrb.mxu1 %v51_v16 }
  0x35   :  { %248 = vmatpush.msrb.mxu0 %v44_v17  ;;  %271 = vmatpush.msrb.mxu1 %v45_v18 }
  0x37   :  { %249 = vmatpush.msrb.mxu0 %v38_v19  ;;  %272 = vmatpush.msrb.mxu1 %v39_v20 }
  0x39   :  { %250 = vmatpush.msrb.mxu0 %v32_v21  ;;  %273 = vmatpush.msrb.mxu1 %v33_v22 }
  0x3b   :  { %251 = vmatpush.msrb.mxu0 %v26_v23  ;;  %274 = vmatpush.msrb.mxu1 %v27_v24 }
  0x3c   :  { %541 = vmatmul.msk.f32.vlgmr.msrb.gmra.mxu0 %vm118_vm1, %v782_v57  ;;  %544 = vmatmul.msk.f32.vlgmr.msrb.gmra.mxu1 %vm118_vm1, %v782_v57 }
  0x44   :  { %542 = vmatmul.msk.f32.gmra.mxu0 %vm118_vm1, %v21_v4  ;;  %545 = vmatmul.msk.f32.gmra.mxu1 %vm118_vm1, %v21_v4 }
  0x7d   :  { %v301_v7 = vpop.permute.xlu2 %300 }
  0x93   :  { %v116_v25 = vpop.permute.xlu0 %115 }
  0x95   :  { %v291_v57 = vpop.permute.xlu1 %290 }
  0x9b   :  { %v161_v26 = vpop.f32.mrf.mxu0  ;;  %v184_v27 = vpop.f32.mrf.mxu1 }
  0x9c   :  { %v111_v31 = vpop.permute.xlu0 %110 }
  0x9d   :  { %v162_v37 = vadd.f32 %v161_v26, %v111_v31  ;;  %v185_v38 = vadd.f32 %v184_v27, %v111_v31 }
  0x9e   :  { %v296_v0 = vpop.permute.xlu1 %295 }
  0xa2   :  { %v207_v29 = vpop.f32.mrf.mxu2  ;;  %v230_v30 = vpop.f32.mrf.mxu3 }
  0xa3   :  { %v208_v44 = vadd.f32 %v207_v29, %v111_v31  ;;  %v231_v45 = vadd.f32 %v230_v30, %v111_v31 }
  0xa4   :  { %v164_v32 = vpop.f32.mrf.mxu0  ;;  %v187_v33 = vpop.f32.mrf.mxu1 }
  0xa5   :  { %v165_v35 = vadd.f32 %v164_v32, %v116_v25  ;;  %v188_v36 = vadd.f32 %v187_v33, %v116_v25 }
  0xa7   :  { %546 = vmatpush.msk.msrb.mxu2 %vm125_vm0, %v165_v35  ;;  %550 = vmatpush.msk.msrb.mxu3 %vm125_vm0, %v188_v36 }
  0xa9   :  { %346 = vmatpush.msrb.mxu2 %v162_v37  ;;  %372 = vmatpush.msrb.mxu3 %v185_v38 }
  0xaa   :  { %547 = vmatmul.msk.f32.vlgmr.msrb.gmra.mxu2 %vm303_vm2, %v282_v39  ;;  %551 = vmatmul.msk.f32.vlgmr.msrb.gmra.mxu3 %vm303_vm2, %v282_v39 }
  0xab   :  { %v210_v40 = vpop.f32.mrf.mxu2  ;;  %v233_v41 = vpop.f32.mrf.mxu3 }
  0xac   :  { %v211_v42 = vadd.f32 %v210_v40, %v116_v25  ;;  %v234_v43 = vadd.f32 %v233_v41, %v116_v25 }
  0xae   :  { %554 = vmatpush.msk.msra.mxu2 %vm125_vm0, %v211_v42  ;;  %558 = vmatpush.msk.msra.mxu3 %vm125_vm0, %v234_v43 }
  0xb0   :  { %398 = vmatpush.msra.mxu2 %v208_v44  ;;  %424 = vmatpush.msra.mxu3 %v231_v45 }
  0xb2   :  { %548 = vmatmul.msk.f32.gmra.mxu2 %vm303_vm2, %v283_v46  ;;  %552 = vmatmul.msk.f32.gmra.mxu3 %vm303_vm2, %v283_v46 }
  0xb9   :  { %v253_v49 = vpop.f32.mrf.mxu0  ;;  %v276_v50 = vpop.f32.mrf.mxu1 }
  0xba   :  { %549 = vmatmul.msk.f32.gmra.mxu2 %vm303_vm2, %v284_v47  ;;  %553 = vmatmul.msk.f32.gmra.mxu3 %vm303_vm2, %v284_v47  ;;  %v254_v55 = vadd.f32 %v253_v49, %v111_v31  ;;  %v277_v56 = vadd.f32 %v276_v50, %v111_v31 }
  0xc1   :  { %v256_v51 = vpop.f32.mrf.mxu0  ;;  %v279_v52 = vpop.f32.mrf.mxu1 }
  0xc2   :  { %v257_v53 = vadd.f32 %v256_v51, %v116_v25  ;;  %v280_v54 = vadd.f32 %v279_v52, %v116_v25  ;;  %555 = vmatmul.msk.f32.vlgmr.msra.gmra.mxu2 %vm303_vm2, %v282_v39  ;;  %559 = vmatmul.msk.f32.vlgmr.msra.gmra.mxu3 %vm303_vm2, %v282_v39 }
  0xc4   :  { %562 = vmatpush.msk.msra.mxu0 %vm125_vm0, %v257_v53  ;;  %566 = vmatpush.msk.msra.mxu1 %vm125_vm0, %v280_v54 }
  0xc6   :  { %450 = vmatpush.msra.mxu0 %v254_v55  ;;  %476 = vmatpush.msra.mxu1 %v277_v56 }
  0xc7   :  { %563 = vmatmul.msk.f32.vlgmr.msra.gmra.mxu0 %vm303_vm2, %v282_v39  ;;  %567 = vmatmul.msk.f32.vlgmr.msra.gmra.mxu1 %vm303_vm2, %v282_v39 }
  0xca   :  { %556 = vmatmul.msk.f32.gmra.mxu2 %vm303_vm2, %v283_v46  ;;  %560 = vmatmul.msk.f32.gmra.mxu3 %vm303_vm2, %v283_v46 }
  0xcf   :  { %564 = vmatmul.msk.f32.gmra.mxu0 %vm303_vm2, %v283_v46  ;;  %568 = vmatmul.msk.f32.gmra.mxu1 %vm303_vm2, %v283_v46 }
  0xd2   :  { %557 = vmatmul.msk.f32.gmra.mxu2 %vm303_vm2, %v284_v47  ;;  %561 = vmatmul.msk.f32.gmra.mxu3 %vm303_vm2, %v284_v47 }
  0xd7   :  { %565 = vmatmul.msk.f32.gmra.mxu0 %vm303_vm2, %v284_v47  ;;  %569 = vmatmul.msk.f32.gmra.mxu1 %vm303_vm2, %v284_v47 }
 0x12d   :  { %v348_v58 = vpop.f32.mrf.mxu2  ;;  %v374_v59 = vpop.f32.mrf.mxu3 }
 0x12e   :  { %v349_v60 = vadd.f32 %v348_v58, %v291_v57  ;;  %v375_v61 = vadd.f32 %v374_v59, %v291_v57 }
 0x130   :  { %v487_v62 = vmax.f32 %v349_v60, 0.0  ;;  %v488_v63 = vmax.f32 %v375_v61, 0.0 }
 0x132   :  { %505 = vst [vmem:[%s1002_s5] sm:$0xff] %v487_v62 }
 0x133   :  { %506 = vst [vmem:[%s1002_s5 + $0x8] sm:$0xff] %v488_v63 }
 0x135   :  { %v351_v1 = vpop.f32.mrf.mxu2  ;;  %v377_v2 = vpop.f32.mrf.mxu3 }
 0x136   :  { %v352_v4 = vadd.f32 %v351_v1, %v296_v0  ;;  %v378_v3 = vadd.f32 %v377_v2, %v296_v0 }
 0x138   :  { %v493_v5 = vmax.f32 %v352_v4, 0.0  ;;  %v494_v6 = vmax.f32 %v378_v3, 0.0 }
 0x13a   :  { %512 = vst [vmem:[%s1002_s5 + $0x30] sm:$0xff] %v493_v5 }
 0x13b   :  { %513 = vst [vmem:[%s1002_s5 + $0x38] sm:$0xff] %v494_v6 }
 0x13d   :  { %v354_v8 = vpop.f32.mrf.mxu2  ;;  %v380_v9 = vpop.f32.mrf.mxu3 }
 0x13e   :  { %v355_v10 = vadd.f32 %v354_v8, %v301_v7  ;;  %v381_v11 = vadd.f32 %v380_v9, %v301_v7 }
 0x140   :  { %v499_v12 = vmax.f32 %v355_v10, 0.0  ;;  %v500_v13 = vmax.f32 %v381_v11, 0.0 }
 0x142   :  { %518 = vst [vmem:[%s1002_s5 + $0x60] sm:$0xff] %v499_v12 }
 0x143   :  { %519 = vst [vmem:[%s1002_s5 + $0x68] sm:$0xff] %v500_v13 }
 0x144   :  { %v452_v14 = vpop.f32.mrf.mxu0  ;;  %v478_v15 = vpop.f32.mrf.mxu1 }
 0x145   :  { %v400_v16 = vpop.f32.mrf.mxu2  ;;  %v426_v17 = vpop.f32.mrf.mxu3  ;;  %v453_v18 = vadd.f32 %v452_v14, %v291_v57  ;;  %v479_v19 = vadd.f32 %v478_v15, %v291_v57 }
 0x146   :  { %v401_v20 = vadd.f32 %v400_v16, %v291_v57  ;;  %v427_v21 = vadd.f32 %v426_v17, %v291_v57 }
 0x147   :  { %v491_v22 = vmax.f32 %v453_v18, 0.0  ;;  %v492_v25 = vmax.f32 %v479_v19, 0.0 }
 0x148   :  { %v489_v23 = vmax.f32 %v401_v20, 0.0  ;;  %v490_v24 = vmax.f32 %v427_v21, 0.0 }
 0x149   :  { %509 = vst [vmem:[%s1002_s5 + $0x20] sm:$0xff] %v491_v22 }
 0x14a   :  { %507 = vst [vmem:[%s1002_s5 + $0x10] sm:$0xff] %v489_v23 }
 0x14b   :  { %508 = vst [vmem:[%s1002_s5 + $0x18] sm:$0xff] %v490_v24 }
 0x14c   :  { %511 = vst.msk [vmem:[%s1002_s5 + $0x28] sm:$0xff] %vm510_vm3, %v492_v25  ;;  %v455_v26 = vpop.f32.mrf.mxu0  ;;  %v481_v27 = vpop.f32.mrf.mxu1 }
 0x14d   :  { %v403_v28 = vpop.f32.mrf.mxu2  ;;  %v429_v29 = vpop.f32.mrf.mxu3  ;;  %v456_v30 = vadd.f32 %v455_v26, %v296_v0  ;;  %v482_v31 = vadd.f32 %v481_v27, %v296_v0 }
 0x14e   :  { %v404_v32 = vadd.f32 %v403_v28, %v296_v0  ;;  %v430_v33 = vadd.f32 %v429_v29, %v296_v0 }
 0x14f   :  { %v497_v34 = vmax.f32 %v456_v30, 0.0  ;;  %v498_v37 = vmax.f32 %v482_v31, 0.0 }
 0x150   :  { %v495_v35 = vmax.f32 %v404_v32, 0.0  ;;  %v496_v36 = vmax.f32 %v430_v33, 0.0 }
 0x151   :  { %516 = vst [vmem:[%s1002_s5 + $0x50] sm:$0xff] %v497_v34 }
 0x152   :  { %514 = vst [vmem:[%s1002_s5 + $0x40] sm:$0xff] %v495_v35 }
 0x153   :  { %515 = vst [vmem:[%s1002_s5 + $0x48] sm:$0xff] %v496_v36 }
 0x154   :  { %517 = vst.msk [vmem:[%s1002_s5 + $0x58] sm:$0xff] %vm510_vm3, %v498_v37  ;;  %v458_v38 = vpop.f32.mrf.mxu0  ;;  %v484_v39 = vpop.f32.mrf.mxu1 }
 0x155   :  { %v406_v40 = vpop.f32.mrf.mxu2  ;;  %v432_v41 = vpop.f32.mrf.mxu3  ;;  %v459_v42 = vadd.f32 %v458_v38, %v301_v7  ;;  %v485_v43 = vadd.f32 %v484_v39, %v301_v7 }
 0x156   :  { %v407_v44 = vadd.f32 %v406_v40, %v301_v7  ;;  %v433_v45 = vadd.f32 %v432_v41, %v301_v7 }
 0x157   :  { %v503_v46 = vmax.f32 %v459_v42, 0.0  ;;  %v504_v49 = vmax.f32 %v485_v43, 0.0 }
 0x158   :  { %v501_v47 = vmax.f32 %v407_v44, 0.0  ;;  %v502_v48 = vmax.f32 %v433_v45, 0.0 }
 0x159   :  { %522 = vst [vmem:[%s1002_s5 + $0x80] sm:$0xff] %v503_v46 }
 0x15a   :  { %520 = vst [vmem:[%s1002_s5 + $0x70] sm:$0xff] %v501_v47 }
 0x15b   :  { %521 = vst [vmem:[%s1002_s5 + $0x78] sm:$0xff] %v502_v48 }
 0x15c   :  { %523 = vst.msk [vmem:[%s1002_s5 + $0x88] sm:$0xff] %vm510_vm3, %v504_v49 }

// kernel: depth_cnn_forward.5
= control target key start
LH: loop header
LB: loop body
LE: loop exit
PB: predicated region body
PF: predicated region fallthrough
CT: control target
= control target key end

     0   :  { %vm137_vm0 = vcmask 719872   ;;  %s3020_s0 = inlined_call_operand.vmem [shape: f32[216,512], index: 0, kind: input, shape index: {}]   ;;  %s3021_s1 = inlined_call_operand.vmem [shape: f32[6,216], index: 1, kind: input, shape index: {}]   ;;  %s3022_s2 = inlined_call_operand.vmem [shape: f32[6,1], index: 2, kind: input, shape index: {}]   ;;  %s3023_s3 = inlined_call_operand.vmem [shape: f32[6,256,10], index: 3, kind: input, shape index: {}]   ;;  %s3024_s4 = inlined_call_operand.vmem [shape: f32[1,10], index: 4, kind: input, shape index: {}]   ;;  %s3025_s5 = inlined_call_operand.hbm [shape: f32[2,10], index: 5, kind: output, shape index: {}]  }
   0x1   :  { %v83_v0 = vld [vmem:[%s3020_s0 + $0x1e0] sm:$0xff]  ;;  %v84_v2 = vld [vmem:[%s3020_s0 + $0x1e8] sm:$0xff]  ;;  %v85_v41 = vld [vmem:[%s3020_s0 + $0x1f0] sm:$0xff] }
   0x2   :  { %v127_v1 = vld [vmem:[%s3020_s0 + $0x340] sm:$0xff]  ;;  %141 = vmatpush.msra.mxu0 %v83_v0  ;;  %v80_v5 = vld [vmem:[%s3020_s0 + $0x1c8] sm:$0xff]  ;;  %181 = vmatpush.msra.mxu2 %v84_v2  ;;  %v81_v45 = vld [vmem:[%s3020_s0 + $0x1d0] sm:$0xff] }
   0x3   :  { %166 = vmatpush.msra.mxu1 %v127_v1  ;;  %v79_v3 = vld [vmem:[%s3020_s0 + $0x1c0] sm:$0xff]  ;;  %v76_v8 = vld [vmem:[%s3020_s0 + $0x1a8] sm:$0xff]  ;;  %v77_v49 = vld [vmem:[%s3020_s0 + $0x1b0] sm:$0xff] }
   0x4   :  { %v123_v4 = vld [vmem:[%s3020_s0 + $0x320] sm:$0xff]  ;;  %142 = vmatpush.msra.mxu0 %v79_v3  ;;  %182 = vmatpush.msra.mxu2 %v80_v5  ;;  %v128_v11 = vld [vmem:[%s3020_s0 + $0x348] sm:$0xff]  ;;  %v73_v53 = vld [vmem:[%s3020_s0 + $0x190] sm:$0xff] }
   0x5   :  { %v75_v6 = vld [vmem:[%s3020_s0 + $0x1a0] sm:$0xff]  ;;  %167 = vmatpush.msra.mxu1 %v123_v4  ;;  %v72_v12 = vld [vmem:[%s3020_s0 + $0x188] sm:$0xff]  ;;  %206 = vmatpush.msra.mxu3 %v128_v11  ;;  %v129_v54 = vld [vmem:[%s3020_s0 + $0x350] sm:$0xff] }
   0x6   :  { %v119_v7 = vld [vmem:[%s3020_s0 + $0x300] sm:$0xff]  ;;  %143 = vmatpush.msra.mxu0 %v75_v6  ;;  %v124_v13 = vld [vmem:[%s3020_s0 + $0x328] sm:$0xff]  ;;  %183 = vmatpush.msra.mxu2 %v76_v8  ;;  %v69_v57 = vld [vmem:[%s3020_s0 + $0x170] sm:$0xff] }
   0x7   :  { %v71_v9 = vld [vmem:[%s3020_s0 + $0x180] sm:$0xff]  ;;  %168 = vmatpush.msra.mxu1 %v119_v7  ;;  %v68_v16 = vld [vmem:[%s3020_s0 + $0x168] sm:$0xff]  ;;  %207 = vmatpush.msra.mxu3 %v124_v13  ;;  %v125_v58 = vld [vmem:[%s3020_s0 + $0x330] sm:$0xff] }
   0x8   :  { %v115_v10 = vld [vmem:[%s3020_s0 + $0x2e0] sm:$0xff]  ;;  %144 = vmatpush.msra.mxu0 %v71_v9  ;;  %v120_v17 = vld [vmem:[%s3020_s0 + $0x308] sm:$0xff]  ;;  %184 = vmatpush.msra.mxu2 %v72_v12  ;;  %v65_v62 = vld [vmem:[%s3020_s0 + $0x150] sm:$0xff] }
   0x9   :  { %v67_v14 = vld [vmem:[%s3020_s0 + $0x160] sm:$0xff]  ;;  %169 = vmatpush.msra.mxu1 %v115_v10  ;;  %v64_v20 = vld [vmem:[%s3020_s0 + $0x148] sm:$0xff]  ;;  %208 = vmatpush.msra.mxu3 %v120_v17  ;;  %v121_v63 = vld [vmem:[%s3020_s0 + $0x310] sm:$0xff]  ;;  %v1251_v17 = vmov 0  }
   0xa   :  { %v111_v15 = vld [vmem:[%s3020_s0 + $0x2c0] sm:$0xff]  ;;  %145 = vmatpush.msra.mxu0 %v67_v14  ;;  %v116_v21 = vld [vmem:[%s3020_s0 + $0x2e8] sm:$0xff]  ;;  %185 = vmatpush.msra.mxu2 %v68_v16  ;;  %v86_v0 = vld [vmem:[%s3020_s0 + $0x1f8] sm:$0xff] }
   0xb   :  { %v63_v18 = vld [vmem:[%s3020_s0 + $0x140] sm:$0xff]  ;;  %170 = vmatpush.msra.mxu1 %v111_v15  ;;  %v60_v24 = vld [vmem:[%s3020_s0 + $0x128] sm:$0xff]  ;;  %209 = vmatpush.msra.mxu3 %v116_v21  ;;  %v61_v2 = vld [vmem:[%s3020_s0 + $0x130] sm:$0xff] }
   0xc   :  { %v107_v19 = vld [vmem:[%s3020_s0 + $0x2a0] sm:$0xff]  ;;  %146 = vmatpush.msra.mxu0 %v63_v18  ;;  %v112_v25 = vld [vmem:[%s3020_s0 + $0x2c8] sm:$0xff]  ;;  %186 = vmatpush.msra.mxu2 %v64_v20  ;;  %v117_v3 = vld [vmem:[%s3020_s0 + $0x2f0] sm:$0xff] }
   0xd   :  { %v59_v22 = vld [vmem:[%s3020_s0 + $0x120] sm:$0xff]  ;;  %171 = vmatpush.msra.mxu1 %v107_v19  ;;  %v56_v28 = vld [vmem:[%s3020_s0 + $0x108] sm:$0xff]  ;;  %210 = vmatpush.msra.mxu3 %v112_v25  ;;  %v82_v4 = vld [vmem:[%s3020_s0 + $0x1d8] sm:$0xff] }
   0xe   :  { %v103_v23 = vld [vmem:[%s3020_s0 + $0x280] sm:$0xff]  ;;  %147 = vmatpush.msra.mxu0 %v59_v22  ;;  %v108_v29 = vld [vmem:[%s3020_s0 + $0x2a8] sm:$0xff]  ;;  %187 = vmatpush.msra.mxu2 %v60_v24  ;;  %v130_v5 = vld [vmem:[%s3020_s0 + $0x358] sm:$0xff] }
   0xf   :  { %v55_v26 = vld [vmem:[%s3020_s0 + $0x100] sm:$0xff]  ;;  %172 = vmatpush.msra.mxu1 %v103_v23  ;;  %v52_v32 = vld [vmem:[%s3020_s0 + $0xe8] sm:$0xff]  ;;  %211 = vmatpush.msra.mxu3 %v108_v29  ;;  %v57_v6 = vld [vmem:[%s3020_s0 + $0x110] sm:$0xff] }
  0x10   :  { %v99_v27 = vld [vmem:[%s3020_s0 + $0x260] sm:$0xff]  ;;  %148 = vmatpush.msra.mxu0 %v55_v26  ;;  %v104_v33 = vld [vmem:[%s3020_s0 + $0x288] sm:$0xff]  ;;  %188 = vmatpush.msra.mxu2 %v56_v28  ;;  %v113_v7 = vld [vmem:[%s3020_s0 + $0x2d0] sm:$0xff] }
  0x11   :  { %v51_v30 = vld [vmem:[%s3020_s0 + $0xe0] sm:$0xff]  ;;  %173 = vmatpush.msra.mxu1 %v99_v27  ;;  %v48_v36 = vld [vmem:[%s3020_s0 + $0xc8] sm:$0xff]  ;;  %212 = vmatpush.msra.mxu3 %v104_v33  ;;  %v78_v8 = vld [vmem:[%s3020_s0 + $0x1b8] sm:$0xff] }
  0x12   :  { %v95_v31 = vld [vmem:[%s3020_s0 + $0x240] sm:$0xff]  ;;  %149 = vmatpush.msra.mxu0 %v51_v30  ;;  %v100_v37 = vld [vmem:[%s3020_s0 + $0x268] sm:$0xff]  ;;  %189 = vmatpush.msra.mxu2 %v52_v32  ;;  %v126_v9 = vld [vmem:[%s3020_s0 + $0x338] sm:$0xff] }
  0x13   :  { %v47_v34 = vld [vmem:[%s3020_s0 + $0xc0] sm:$0xff]  ;;  %174 = vmatpush.msra.mxu1 %v95_v31  ;;  %v44_v40 = vld [vmem:[%s3020_s0 + $0xa8] sm:$0xff]  ;;  %213 = vmatpush.msra.mxu3 %v100_v37  ;;  %v53_v10 = vld [vmem:[%s3020_s0 + $0xf0] sm:$0xff] }
  0x14   :  { %v91_v35 = vld [vmem:[%s3020_s0 + $0x220] sm:$0xff]  ;;  %150 = vmatpush.msra.mxu0 %v47_v34  ;;  %190 = vmatpush.msra.mxu2 %v48_v36  ;;  %v96_v43 = vld [vmem:[%s3020_s0 + $0x248] sm:$0xff]  ;;  %v109_v11 = vld [vmem:[%s3020_s0 + $0x2b0] sm:$0xff] }
  0x15   :  { %v43_v38 = vld [vmem:[%s3020_s0 + $0xa0] sm:$0xff]  ;;  %175 = vmatpush.msra.mxu1 %v91_v35  ;;  %v40_v44 = vld [vmem:[%s3020_s0 + $0x88] sm:$0xff]  ;;  %214 = vmatpush.msra.mxu3 %v96_v43  ;;  %v74_v12 = vld [vmem:[%s3020_s0 + $0x198] sm:$0xff] }
  0x16   :  { %v87_v39 = vld [vmem:[%s3020_s0 + $0x200] sm:$0xff]  ;;  %151 = vmatpush.msra.mxu0 %v43_v38  ;;  %191 = vmatpush.msra.mxu2 %v44_v40  ;;  %v92_v47 = vld [vmem:[%s3020_s0 + $0x228] sm:$0xff]  ;;  %v49_v13 = vld [vmem:[%s3020_s0 + $0xd0] sm:$0xff] }
  0x17   :  { %v39_v42 = vld [vmem:[%s3020_s0 + $0x80] sm:$0xff]  ;;  %176 = vmatpush.msra.mxu1 %v87_v39  ;;  %v36_v48 = vld [vmem:[%s3020_s0 + $0x68] sm:$0xff]  ;;  %215 = vmatpush.msra.mxu3 %v92_v47  ;;  %v105_v14 = vld [vmem:[%s3020_s0 + $0x290] sm:$0xff] }
  0x18   :  { %v35_v46 = vld [vmem:[%s3020_s0 + $0x60] sm:$0xff]  ;;  %152 = vmatpush.msra.mxu0 %v39_v42  ;;  %192 = vmatpush.msra.mxu2 %v40_v44  ;;  %v88_v51 = vld [vmem:[%s3020_s0 + $0x208] sm:$0xff]  ;;  %v70_v15 = vld [vmem:[%s3020_s0 + $0x178] sm:$0xff] }
  0x19   :  { %221 = vmatpush.msrb.mxu1 %v85_v41  ;;  %v31_v50 = vld [vmem:[%s3020_s0 + $0x40] sm:$0xff]  ;;  %v32_v52 = vld [vmem:[%s3020_s0 + $0x48] sm:$0xff]  ;;  %216 = vmatpush.msra.mxu3 %v88_v51  ;;  %v122_v16 = vld [vmem:[%s3020_s0 + $0x318] sm:$0xff] }
  0x1a   :  { %153 = vmatpush.msra.mxu0 %v35_v46  ;;  %193 = vmatpush.msra.mxu2 %v36_v48  ;;  %v27_v55 = vld [vmem:[%s3020_s0 + $0x20] sm:$0xff]  ;;  %v28_v56 = vld [vmem:[%s3020_s0 + $0x28] sm:$0xff]  ;;  %v45_v18 = vld [vmem:[%s3020_s0 + $0xb0] sm:$0xff] }
  0x1b   :  { %222 = vmatpush.msrb.mxu1 %v81_v45  ;;  %v23_v59 = vld [vmem:[%s3020_s0] sm:$0xff]  ;;  %246 = vmatpush.msrb.mxu3 %v129_v54  ;;  %v24_v60 = vld [vmem:[%s3020_s0 + $0x8] sm:$0xff]  ;;  %v101_v19 = vld [vmem:[%s3020_s0 + $0x270] sm:$0xff] }
  0x1c   :  { %154 = vmatpush.msra.mxu0 %v31_v50  ;;  %194 = vmatpush.msra.mxu2 %v32_v52  ;;  %v1469_v61 = vld [vmem:[%s3021_s1] sm:$0x3f]  ;;  %v1484_v1 = vld [vmem:[%s3021_s1 + $0x8] sm:$0x3f]  ;;  %v66_v20 = vld [vmem:[%s3020_s0 + $0x158] sm:$0xff] }
  0x1d   :  { %223 = vmatpush.msrb.mxu1 %v77_v49  ;;  %247 = vmatpush.msrb.mxu3 %v125_v58  ;;  %v131_v21 = vld [vmem:[%s3022_s2] sm:$0x3f]  ;;  %v41_v22 = vld [vmem:[%s3020_s0 + $0x90] sm:$0xff]  ;;  %v62_v24 = vld [vmem:[%s3020_s0 + $0x138] sm:$0xff] }
  0x1e   :  { %155 = vmatpush.msra.mxu0 %v27_v55  ;;  %195 = vmatpush.msra.mxu2 %v28_v56  ;;  %v97_v23 = vld [vmem:[%s3020_s0 + $0x250] sm:$0xff]  ;;  %v118_v25 = vld [vmem:[%s3020_s0 + $0x2f8] sm:$0xff] }
  0x1f   :  { %224 = vmatpush.msrb.mxu1 %v73_v53  ;;  %248 = vmatpush.msrb.mxu3 %v121_v63  ;;  %v37_v26 = vld [vmem:[%s3020_s0 + $0x70] sm:$0xff]  ;;  %v58_v28 = vld [vmem:[%s3020_s0 + $0x118] sm:$0xff] }
  0x20   :  { %156 = vmatpush.msra.mxu0 %v23_v59  ;;  %196 = vmatpush.msra.mxu2 %v24_v60  ;;  %v93_v27 = vld [vmem:[%s3020_s0 + $0x230] sm:$0xff]  ;;  %v114_v29 = vld [vmem:[%s3020_s0 + $0x2d8] sm:$0xff] }
  0x21   :  { %225 = vmatpush.msrb.mxu1 %v69_v57  ;;  %157 = vmatmul.f32.vlgmr.msra.gmra.mxu0 %v1469_v61  ;;  %v33_v30 = vld [vmem:[%s3020_s0 + $0x50] sm:$0xff]  ;;  %v54_v32 = vld [vmem:[%s3020_s0 + $0xf8] sm:$0xff] }
  0x22   :  { %197 = vmatmul.f32.vlgmr.msra.gmra.mxu2 %v1469_v61  ;;  %261 = vmatpush.msrb.mxu0 %v86_v0  ;;  %v89_v31 = vld [vmem:[%s3020_s0 + $0x210] sm:$0xff]  ;;  %v110_v33 = vld [vmem:[%s3020_s0 + $0x2b8] sm:$0xff] }
  0x23   :  { %226 = vmatpush.msrb.mxu1 %v65_v62  ;;  %1059 = vmatmul.msk.f32.vlgmr.msra.gmra.mxu3 %vm137_vm0, %v1484_v1 }
  0x24   :  { %1058 = vmatmul.msk.f32.vlgmr.msra.gmra.mxu1 %vm137_vm0, %v1484_v1  ;;  %249 = vmatpush.msrb.mxu3 %v117_v3 }
  0x25   :  { %227 = vmatpush.msrb.mxu1 %v61_v2  ;;  %262 = vmatpush.msrb.mxu0 %v82_v4 }
  0x26   :  { %286 = vmatpush.msrb.mxu2 %v130_v5  ;;  %250 = vmatpush.msrb.mxu3 %v113_v7 }
  0x27   :  { %228 = vmatpush.msrb.mxu1 %v57_v6  ;;  %263 = vmatpush.msrb.mxu0 %v78_v8 }
  0x28   :  { %287 = vmatpush.msrb.mxu2 %v126_v9  ;;  %251 = vmatpush.msrb.mxu3 %v109_v11 }
  0x29   :  { %229 = vmatpush.msrb.mxu1 %v53_v10  ;;  %264 = vmatpush.msrb.mxu0 %v74_v12 }
  0x2a   :  { %1224 = vset.pattern.permute.xlu0 %v1251_v17  ;;  %252 = vmatpush.msrb.mxu3 %v105_v14 }
  0x2b   :  { %230 = vmatpush.msrb.mxu1 %v49_v13  ;;  %265 = vmatpush.msrb.mxu0 %v70_v15 }
  0x2c   :  { %288 = vmatpush.msrb.mxu2 %v122_v16  ;;  %253 = vmatpush.msrb.mxu3 %v101_v19 }
  0x2d   :  { %231 = vmatpush.msrb.mxu1 %v45_v18  ;;  %266 = vmatpush.msrb.mxu0 %v66_v20 }
  0x2e   :  { %134 = vperm.xlu0 %1224, %v131_v21   ;;  %254 = vmatpush.msrb.mxu3 %v97_v23 }
  0x2f   :  { %232 = vmatpush.msrb.mxu1 %v41_v22  ;;  %267 = vmatpush.msrb.mxu0 %v62_v24 }
  0x30   :  { %289 = vmatpush.msrb.mxu2 %v118_v25  ;;  %255 = vmatpush.msrb.mxu3 %v93_v27 }
  0x31   :  { %233 = vmatpush.msrb.mxu1 %v37_v26 }
  0x32   :  { %10 = vsyncpa [#allocation3], 0  ;;  %268 = vmatpush.msrb.mxu0 %v58_v28  ;;  %290 = vmatpush.msrb.mxu2 %v114_v29  ;;  %v29_v34 = vld [vmem:[%s3020_s0 + $0x30] sm:$0xff]  ;;  %v50_v35 = vld [vmem:[%s3020_s0 + $0xd8] sm:$0xff]  ;;  %s1049_s6 = sshll.u32 %s3025_s5, 4  ;;  %vm1038_vm1 = vcmask 1040384   ;;  %s1050_s6 = int_to_ptr.hbm [resolvable:$true] %s1049_s6 }
  0x33   :  { %234 = vmatpush.msrb.mxu1 %v33_v30  ;;  %256 = vmatpush.msrb.mxu3 %v89_v31  ;;  %v106_v36 = vld [vmem:[%s3020_s0 + $0x298] sm:$0xff]  ;;  %v25_v37 = vld [vmem:[%s3020_s0 + $0x10] sm:$0xff]  ;;  %v1624_v44 = vld [vmem:[%s3023_s3 + $0x68] sm:$0xff]  ;;  %vm1040_vm2 = vcmask 74752  }
  0x34   :  { %269 = vmatpush.msrb.mxu0 %v54_v32  ;;  %291 = vmatpush.msrb.mxu2 %v110_v33  ;;  %v1599_v38 = vld [vmem:[%s3023_s3 + $0x78] sm:$0xff]  ;;  %v1612_v41 = vld [vmem:[%s3023_s3 + $0x70] sm:$0xff]  ;;  %v1642_v48 = vld [vmem:[%s3023_s3 + $0x60] sm:$0xff] }
  0x35   :  { %1060 = vmatmul.msk.f32.vlgmr.msrb.gmra.mxu3 %vm137_vm0, %v1484_v1  ;;  %235 = vmatpush.msrb.mxu1 %v29_v34  ;;  %v46_v39 = vld [vmem:[%s3020_s0 + $0xb8] sm:$0xff]  ;;  %v1647_v49 = vld [vmem:[%s3023_s3 + $0xf0] sm:$0xff]  ;;  %v1680_v56 = vld [vmem:[%s3023_s3 + $0xe8] sm:$0xff] }
  0x36   :  { %v102_v40 = vld [vmem:[%s3020_s0 + $0x278] sm:$0xff]  ;;  %270 = vmatpush.msrb.mxu0 %v50_v35  ;;  %292 = vmatpush.msrb.mxu2 %v106_v36  ;;  %v1675_v55 = vld [vmem:[%s3023_s3 + $0x50] sm:$0xff]  ;;  %v1697_v59 = vld [vmem:[%s3023_s3 + $0x48] sm:$0xff] }
  0x37   :  { %236 = vmatpush.msrb.mxu1 %v25_v37  ;;  %v42_v42 = vld [vmem:[%s3020_s0 + $0x98] sm:$0xff]  ;;  %334 = vmatpush.msra.mxu3 %v1599_v38  ;;  %v1690_v58 = vld [vmem:[%s3023_s3 + $0x170] sm:$0xff]  ;;  %v1702_v60 = vld [vmem:[%s3023_s3 + $0x168] sm:$0xff] }
  0x38   :  { %v98_v43 = vld [vmem:[%s3020_s0 + $0x258] sm:$0xff]  ;;  %271 = vmatpush.msrb.mxu0 %v46_v39  ;;  %293 = vmatpush.msrb.mxu2 %v102_v40  ;;  %v1715_v63 = vld [vmem:[%s3023_s3 + $0xe0] sm:$0xff]  ;;  %v1731_v2 = vld [vmem:[%s3023_s3 + $0x1f0] sm:$0xff] }
  0x39   :  { %v1629_v45 = vld [vmem:[%s3023_s3 + $0xf8] sm:$0xff]  ;;  %237 = vmatmul.f32.vlgmr.msrb.gmra.mxu1 %v1469_v61  ;;  %335 = vmatpush.msra.mxu3 %v1612_v41  ;;  %v1720_v0 = vld [vmem:[%s3023_s3 + $0x40] sm:$0xff]  ;;  %v1755_v5 = vld [vmem:[%s3023_s3 + $0x1e8] sm:$0xff] }
  0x3a   :  { %v38_v46 = vld [vmem:[%s3020_s0 + $0x78] sm:$0xff]  ;;  %272 = vmatpush.msrb.mxu0 %v42_v42  ;;  %294 = vmatpush.msrb.mxu2 %v98_v43  ;;  %v1763_v6 = vld [vmem:[%s3023_s3 + $0xd0] sm:$0xff]  ;;  %v1779_v9 = vld [vmem:[%s3023_s3 + $0x1e0] sm:$0xff] }
  0x3b   :  { %v94_v47 = vld [vmem:[%s3020_s0 + $0x238] sm:$0xff]  ;;  %336 = vmatpush.msra.mxu3 %v1624_v44  ;;  %354 = vmatpush.msra.mxu1 %v1629_v45  ;;  %v1768_v7 = vld [vmem:[%s3023_s3 + $0x30] sm:$0xff]  ;;  %v1787_v10 = vld [vmem:[%s3023_s3 + $0xc8] sm:$0xff] }
  0x3c   :  { %v34_v50 = vld [vmem:[%s3020_s0 + $0x58] sm:$0xff]  ;;  %273 = vmatpush.msrb.mxu0 %v38_v46  ;;  %295 = vmatpush.msrb.mxu2 %v94_v47  ;;  %v1773_v8 = vld [vmem:[%s3023_s3 + $0x150] sm:$0xff]  ;;  %v1792_v11 = vld [vmem:[%s3023_s3 + $0x28] sm:$0xff] }
  0x3d   :  { %v90_v51 = vld [vmem:[%s3020_s0 + $0x218] sm:$0xff]  ;;  %337 = vmatpush.msra.mxu3 %v1642_v48  ;;  %355 = vmatpush.msra.mxu1 %v1647_v49  ;;  %v1797_v12 = vld [vmem:[%s3023_s3 + $0x148] sm:$0xff]  ;;  %v1811_v14 = vld [vmem:[%s3023_s3 + $0xc0] sm:$0xff] }
  0x3e   :  { %v1660_v52 = vld [vmem:[%s3023_s3 + $0x58] sm:$0xff]  ;;  %274 = vmatpush.msrb.mxu0 %v34_v50  ;;  %296 = vmatpush.msrb.mxu2 %v90_v51  ;;  %v1816_v15 = vld [vmem:[%s3023_s3 + $0x20] sm:$0xff]  ;;  %v1827_v17 = vld [vmem:[%s3023_s3 + $0x1d0] sm:$0xff] }
  0x3f   :  { %v30_v53 = vld [vmem:[%s3020_s0 + $0x38] sm:$0xff]  ;;  %1061 = vmatmul.msk.f32.vlgmr.msrb.gmra.mxu2 %vm137_vm0, %v1484_v1  ;;  %338 = vmatpush.msra.mxu3 %v1660_v52  ;;  %v1726_v1 = vld [vmem:[%s3023_s3 + $0x160] sm:$0xff]  ;;  %v1851_v21 = vld [vmem:[%s3023_s3 + $0x1c8] sm:$0xff] }
  0x40   :  { %v1668_v54 = vld [vmem:[%s3023_s3 + $0x178] sm:$0xff]  ;;  %275 = vmatpush.msrb.mxu0 %v30_v53  ;;  %356 = vmatpush.msra.mxu1 %v1680_v56  ;;  %v1821_v16 = vld [vmem:[%s3023_s3 + $0x140] sm:$0xff]  ;;  %v1859_v22 = vld [vmem:[%s3023_s3 + $0xb0] sm:$0xff] }
  0x41   :  { %v26_v57 = vld [vmem:[%s3020_s0 + $0x18] sm:$0xff]  ;;  %414 = vmatpush.msra.mxu2 %v1668_v54  ;;  %339 = vmatpush.msra.mxu3 %v1675_v55  ;;  %v1864_v23 = vld [vmem:[%s3023_s3 + $0x10] sm:$0xff]  ;;  %v1875_v25 = vld [vmem:[%s3023_s3 + $0x1c0] sm:$0xff] }
  0x42   :  { %v1707_v62 = vld [vmem:[%s3023_s3 + $0x1f8] sm:$0xff]  ;;  %276 = vmatpush.msrb.mxu0 %v26_v57  ;;  %357 = vmatpush.msra.mxu1 %v1715_v63  ;;  %v1869_v24 = vld [vmem:[%s3023_s3 + $0x130] sm:$0xff]  ;;  %v1883_v26 = vld [vmem:[%s3023_s3 + $0xa8] sm:$0xff] }
  0x43   :  { %415 = vmatpush.msra.mxu2 %v1690_v58  ;;  %277 = vmatmul.f32.vlgmr.msrb.gmra.mxu0 %v1469_v61  ;;  %v1739_v61 = vld [vmem:[%s3023_s3 + $0xd8] sm:$0xff]  ;;  %v1888_v27 = vld [vmem:[%s3023_s3 + $0x8] sm:$0xff]  ;;  %v1907_v30 = vld [vmem:[%s3023_s3 + $0xa0] sm:$0xff] }
  0x44   :  { %340 = vmatpush.msra.mxu3 %v1697_v59  ;;  %434 = vmatpush.msra.mxu0 %v1707_v62  ;;  %v1744_v3 = vld [vmem:[%s3023_s3 + $0x38] sm:$0xff]  ;;  %v1893_v28 = vld [vmem:[%s3023_s3 + $0x128] sm:$0xff]  ;;  %v1912_v31 = vld [vmem:[%s3023_s3] sm:$0xff] }
  0x45   :  { %416 = vmatpush.msra.mxu2 %v1702_v60  ;;  %v1749_v4 = vld [vmem:[%s3023_s3 + $0x158] sm:$0xff]  ;;  %358 = vmatpush.msra.mxu1 %v1739_v61  ;;  %3156 = vst [vmem:[#allocation5_spill] sm:$0xff] %v1912_v31  ;;  %v1917_v32 = vld [vmem:[%s3023_s3 + $0x120] sm:$0xff]  ;;  %v1923_v33 = vld [vmem:[%s3023_s3 + $0x1b0] sm:$0xff] }
  0x46   :  { %341 = vmatpush.msra.mxu3 %v1720_v0  ;;  %435 = vmatpush.msra.mxu0 %v1731_v2  ;;  %v1803_v13 = vld [vmem:[%s3023_s3 + $0x1d8] sm:$0xff]  ;;  %v1947_v37 = vld [vmem:[%s3023_s3 + $0x1a8] sm:$0xff]  ;;  %v1955_v39 = vld [vmem:[%s3023_s3 + $0x90] sm:$0xff] }
  0x47   :  { %417 = vmatpush.msra.mxu2 %v1726_v1  ;;  %359 = vmatpush.msra.mxu1 %v1763_v6  ;;  %v1835_v18 = vld [vmem:[%s3023_s3 + $0xb8] sm:$0xff]  ;;  %3159 = vst [vmem:[#allocation8_spill] sm:$0xff] %v1955_v39  ;;  %v1960_v40 = vld [vmem:[%s3023_s3 + $0x270] sm:$0xff]  ;;  %v1971_v43 = vld [vmem:[%s3023_s3 + $0x1a0] sm:$0xff] }
  0x48   :  { %342 = vmatpush.msra.mxu3 %v1744_v3  ;;  %436 = vmatpush.msra.mxu0 %v1755_v5  ;;  %v1840_v19 = vld [vmem:[%s3023_s3 + $0x18] sm:$0xff]  ;;  %3160 = vst [vmem:[#allocation9_spill] sm:$0xff] %v1960_v40  ;;  %v1965_v42 = vld [vmem:[%s3023_s3 + $0x110] sm:$0xff]  ;;  %v1979_v46 = vld [vmem:[%s3023_s3 + $0x88] sm:$0xff] }
  0x49   :  { %418 = vmatpush.msra.mxu2 %v1749_v4  ;;  %360 = vmatpush.msra.mxu1 %v1787_v10  ;;  %v1845_v20 = vld [vmem:[%s3023_s3 + $0x138] sm:$0xff]  ;;  %3161 = vst [vmem:[#allocation10_spill] sm:$0xff] %v1971_v43  ;;  %v1984_v47 = vld [vmem:[%s3023_s3 + $0x268] sm:$0xff]  ;;  %v2003_v53 = vld [vmem:[%s3023_s3 + $0x80] sm:$0xff] }
  0x4a   :  { %343 = vmatpush.msra.mxu3 %v1768_v7  ;;  %437 = vmatpush.msra.mxu0 %v1779_v9  ;;  %v1899_v29 = vld [vmem:[%s3023_s3 + $0x1b8] sm:$0xff]  ;;  %3162 = vst [vmem:[#allocation11_spill] sm:$0xff] %v1979_v46  ;;  %v1989_v50 = vld [vmem:[%s3023_s3 + $0x108] sm:$0xff]  ;;  %v2008_v57 = vld [vmem:[%s3023_s3 + $0x260] sm:$0xff] }
  0x4b   :  { %419 = vmatpush.msra.mxu2 %v1773_v8  ;;  %361 = vmatpush.msra.mxu1 %v1811_v14  ;;  %v1931_v34 = vld [vmem:[%s3023_s3 + $0x98] sm:$0xff]  ;;  %3163 = vst [vmem:[#allocation12_spill] sm:$0xff] %v1984_v47 }
  0x4c   :  { %344 = vmatpush.msra.mxu3 %v1792_v11  ;;  %438 = vmatpush.msra.mxu0 %v1803_v13  ;;  %3157 = vst [vmem:[#allocation6_spill] sm:$0xff] %v1931_v34  ;;  %v1936_v35 = vld [vmem:[%s3023_s3 + $0x278] sm:$0xff] }
  0x4d   :  { %420 = vmatpush.msra.mxu2 %v1797_v12  ;;  %362 = vmatpush.msra.mxu1 %v1835_v18  ;;  %3158 = vst [vmem:[#allocation7_spill] sm:$0xff] %v1936_v35  ;;  %v1941_v36 = vld [vmem:[%s3023_s3 + $0x118] sm:$0xff] }
  0x4e   :  { %345 = vmatpush.msra.mxu3 %v1816_v15  ;;  %439 = vmatpush.msra.mxu0 %v1827_v17  ;;  %3164 = vst [vmem:[#allocation13_spill] sm:$0xff] %v1989_v50  ;;  %v1995_v51 = vld [vmem:[%s3023_s3 + $0x198] sm:$0xff] }
  0x4f   :  { %421 = vmatpush.msra.mxu2 %v1821_v16  ;;  %363 = vmatpush.msra.mxu1 %v1859_v22  ;;  %3165 = vst [vmem:[#allocation14_spill] sm:$0xff] %v1995_v51 }
  0x50   :  { %346 = vmatpush.msra.mxu3 %v1840_v19  ;;  %440 = vmatpush.msra.mxu0 %v1851_v21  ;;  %3166 = vst [vmem:[#allocation15_spill] sm:$0xff] %v2003_v53 }
  0x51   :  { %422 = vmatpush.msra.mxu2 %v1845_v20  ;;  %364 = vmatpush.msra.mxu1 %v1883_v26  ;;  %3167 = vst [vmem:[#allocation16_spill] sm:$0xff] %v2008_v57 }
  0x52   :  { %347 = vmatpush.msra.mxu3 %v1864_v23  ;;  %441 = vmatpush.msra.mxu0 %v1875_v25 }
  0x53   :  { %423 = vmatpush.msra.mxu2 %v1869_v24  ;;  %365 = vmatpush.msra.mxu1 %v1907_v30 }
  0x54   :  { %348 = vmatpush.msra.mxu3 %v1888_v27  ;;  %442 = vmatpush.msra.mxu0 %v1899_v29 }
  0x55   :  { %424 = vmatpush.msra.mxu2 %v1893_v28  ;;  %366 = vmatpush.msra.mxu1 %v1931_v34  ;;  %v2432_v34 = vld [vmem:[%s3023_s3 + $0x570] sm:$0xff] }
  0x56   :  { %349 = vmatpush.msra.mxu3 %v1912_v31  ;;  %443 = vmatpush.msra.mxu0 %v1923_v33  ;;  %3236 = vst [vmem:[#allocation85_spill] sm:$0xff] %v2432_v34 }
  0x57   :  { %425 = vmatpush.msra.mxu2 %v1917_v32  ;;  %367 = vmatpush.msra.mxu1 %v1955_v39  ;;  %v2027_v39 = vld [vmem:[%s3023_s3 + $0x378] sm:$0xff] }
  0x58   :  { %492 = vmatpush.msrb.mxu3 %v1936_v35  ;;  %444 = vmatpush.msra.mxu0 %v1947_v37  ;;  %v2013_v35 = vld [vmem:[%s3023_s3 + $0x100] sm:$0xff]  ;;  %3170 = vst [vmem:[#allocation19_spill] sm:$0xff] %v2027_v39 }
  0x59   :  { %426 = vmatpush.msra.mxu2 %v1941_v36  ;;  %3168 = vst [vmem:[#allocation17_spill] sm:$0xff] %v2013_v35  ;;  %368 = vmatpush.msra.mxu1 %v1979_v46  ;;  %v2032_v46 = vld [vmem:[%s3023_s3 + $0x2f8] sm:$0xff] }
  0x5a   :  { %493 = vmatpush.msrb.mxu3 %v1960_v40  ;;  %445 = vmatpush.msra.mxu0 %v1971_v43  ;;  %v2019_v40 = vld [vmem:[%s3023_s3 + $0x190] sm:$0xff]  ;;  %3171 = vst [vmem:[#allocation20_spill] sm:$0xff] %v2032_v46 }
  0x5b   :  { %427 = vmatpush.msra.mxu2 %v1965_v42  ;;  %3169 = vst [vmem:[#allocation18_spill] sm:$0xff] %v2019_v40  ;;  %369 = vmatpush.msra.mxu1 %v2003_v53  ;;  %v2051_v53 = vld [vmem:[%s3023_s3 + $0x370] sm:$0xff] }
  0x5c   :  { %494 = vmatpush.msrb.mxu3 %v1984_v47  ;;  %446 = vmatpush.msra.mxu0 %v1995_v51  ;;  %v2038_v47 = vld [vmem:[%s3023_s3 + $0x188] sm:$0xff]  ;;  %v2044_v51 = vld [vmem:[%s3023_s3 + $0x258] sm:$0xff]  ;;  %3174 = vst [vmem:[#allocation23_spill] sm:$0xff] %v2051_v53  ;;  %v2056_v43 = vld [vmem:[%s3023_s3 + $0x2f0] sm:$0xff] }
  0x5d   :  { %428 = vmatpush.msra.mxu2 %v1989_v50  ;;  %3172 = vst [vmem:[#allocation21_spill] sm:$0xff] %v2038_v47  ;;  %512 = vmatpush.msrb.mxu1 %v2032_v46  ;;  %v2080_v46 = vld [vmem:[%s3023_s3 + $0x3f8] sm:$0xff]  ;;  %v2427_v50 = vld [vmem:[%s3023_s3 + $0x468] sm:$0xff] }
  0x5e   :  { %495 = vmatpush.msrb.mxu3 %v2008_v57  ;;  %3173 = vst [vmem:[#allocation22_spill] sm:$0xff] %v2044_v51  ;;  %447 = vmatpush.msra.mxu0 %v2019_v40  ;;  %v2063_v57 = vld [vmem:[%s3023_s3 + $0x180] sm:$0xff]  ;;  %v2068_v40 = vld [vmem:[%s3023_s3 + $0x250] sm:$0xff] }
  0x5f   :  { %429 = vmatpush.msra.mxu2 %v2013_v35  ;;  %3175 = vst [vmem:[#allocation24_spill] sm:$0xff] %v2056_v43  ;;  %v2074_v35 = vld [vmem:[%s3023_s3 + $0x368] sm:$0xff]  ;;  %513 = vmatpush.msrb.mxu1 %v2056_v43  ;;  %v2104_v43 = vld [vmem:[%s3023_s3 + $0x3f0] sm:$0xff] }
  0x60   :  { %3176 = vst [vmem:[#allocation25_spill] sm:$0xff] %v2063_v57  ;;  %448 = vmatpush.msra.mxu0 %v2038_v47  ;;  %496 = vmatpush.msrb.mxu3 %v2044_v51  ;;  %v2087_v47 = vld [vmem:[%s3023_s3 + $0x2e8] sm:$0xff]  ;;  %v2098_v51 = vld [vmem:[%s3023_s3 + $0x360] sm:$0xff] }
  0x61   :  { %570 = vmatpush.msrb.mxu2 %v2027_v39  ;;  %3177 = vst [vmem:[#allocation26_spill] sm:$0xff] %v2068_v40  ;;  %v2092_v39 = vld [vmem:[%s3023_s3 + $0x248] sm:$0xff]  ;;  %514 = vmatpush.msrb.mxu1 %v2087_v47 }
  0x62   :  { %3178 = vst [vmem:[#allocation27_spill] sm:$0xff] %v2074_v35  ;;  %449 = vmatpush.msra.mxu0 %v2063_v57  ;;  %497 = vmatpush.msrb.mxu3 %v2068_v40  ;;  %v2111_v57 = vld [vmem:[%s3023_s3 + $0x2e0] sm:$0xff]  ;;  %v2122_v40 = vld [vmem:[%s3023_s3 + $0x358] sm:$0xff] }
  0x63   :  { %3179 = vst [vmem:[#allocation28_spill] sm:$0xff] %v2080_v46  ;;  %571 = vmatpush.msrb.mxu2 %v2051_v53  ;;  %v2116_v53 = vld [vmem:[%s3023_s3 + $0x240] sm:$0xff]  ;;  %515 = vmatpush.msrb.mxu1 %v2111_v57 }
  0x64   :  { %3180 = vst [vmem:[#allocation29_spill] sm:$0xff] %v2087_v47  ;;  %590 = vmatpush.msrb.mxu0 %v2080_v46  ;;  %498 = vmatpush.msrb.mxu3 %v2092_v39  ;;  %v2128_v46 = vld [vmem:[%s3023_s3 + $0x3e8] sm:$0xff]  ;;  %v2135_v47 = vld [vmem:[%s3023_s3 + $0x2d8] sm:$0xff] }
  0x65   :  { %3181 = vst [vmem:[#allocation30_spill] sm:$0xff] %v2092_v39  ;;  %572 = vmatpush.msrb.mxu2 %v2074_v35  ;;  %v2140_v35 = vld [vmem:[%s3023_s3 + $0x238] sm:$0xff]  ;;  %v2146_v39 = vld [vmem:[%s3023_s3 + $0x350] sm:$0xff]  ;;  %516 = vmatpush.msrb.mxu1 %v2135_v47 }
  0x66   :  { %3182 = vst [vmem:[#allocation31_spill] sm:$0xff] %v2098_v51  ;;  %591 = vmatpush.msrb.mxu0 %v2104_v43  ;;  %499 = vmatpush.msrb.mxu3 %v2116_v53 }
  0x67   :  { %3183 = vst [vmem:[#allocation32_spill] sm:$0xff] %v2104_v43  ;;  %573 = vmatpush.msrb.mxu2 %v2098_v51  ;;  %v2152_v43 = vld [vmem:[%s3023_s3 + $0x3e0] sm:$0xff]  ;;  %v2164_v51 = vld [vmem:[%s3023_s3 + $0x230] sm:$0xff] }
  0x68   :  { %3184 = vst [vmem:[#allocation33_spill] sm:$0xff] %v2111_v57  ;;  %592 = vmatpush.msrb.mxu0 %v2128_v46  ;;  %v2159_v57 = vld [vmem:[%s3023_s3 + $0x2d0] sm:$0xff]  ;;  %500 = vmatpush.msrb.mxu3 %v2140_v35 }
  0x69   :  { %3185 = vst [vmem:[#allocation34_spill] sm:$0xff] %v2116_v53  ;;  %574 = vmatpush.msrb.mxu2 %v2122_v40  ;;  %v2170_v53 = vld [vmem:[%s3023_s3 + $0x348] sm:$0xff]  ;;  %517 = vmatpush.msrb.mxu1 %v2159_v57 }
  0x6a   :  { %3186 = vst [vmem:[#allocation35_spill] sm:$0xff] %v2122_v40  ;;  %593 = vmatpush.msrb.mxu0 %v2152_v43  ;;  %v2188_v40 = vld [vmem:[%s3023_s3 + $0x228] sm:$0xff]  ;;  %501 = vmatpush.msrb.mxu3 %v2164_v51 }
  0x6b   :  { %3187 = vst [vmem:[#allocation36_spill] sm:$0xff] %v2128_v46  ;;  %v2176_v46 = vld [vmem:[%s3023_s3 + $0x3d8] sm:$0xff]  ;;  %575 = vmatpush.msrb.mxu2 %v2146_v39 }
  0x6c   :  { %3188 = vst [vmem:[#allocation37_spill] sm:$0xff] %v2135_v47  ;;  %v2183_v47 = vld [vmem:[%s3023_s3 + $0x2c8] sm:$0xff]  ;;  %594 = vmatpush.msrb.mxu0 %v2176_v46  ;;  %502 = vmatpush.msrb.mxu3 %v2188_v40 }
  0x6d   :  { %3189 = vst [vmem:[#allocation38_spill] sm:$0xff] %v2140_v35  ;;  %v2194_v35 = vld [vmem:[%s3023_s3 + $0x340] sm:$0xff]  ;;  %576 = vmatpush.msrb.mxu2 %v2170_v53  ;;  %518 = vmatpush.msrb.mxu1 %v2183_v47 }
  0x6e   :  { %3190 = vst [vmem:[#allocation39_spill] sm:$0xff] %v2146_v39  ;;  %v2212_v39 = vld [vmem:[%s3023_s3 + $0x220] sm:$0xff] }
  0x6f   :  { %3191 = vst [vmem:[#allocation40_spill] sm:$0xff] %v2152_v43  ;;  %v2200_v43 = vld [vmem:[%s3023_s3 + $0x3d0] sm:$0xff]  ;;  %577 = vmatpush.msrb.mxu2 %v2194_v35  ;;  %503 = vmatpush.msrb.mxu3 %v2212_v39 }
  0x70   :  { %3192 = vst [vmem:[#allocation41_spill] sm:$0xff] %v2159_v57  ;;  %v2207_v57 = vld [vmem:[%s3023_s3 + $0x2c0] sm:$0xff]  ;;  %595 = vmatpush.msrb.mxu0 %v2200_v43 }
  0x71   :  { %3193 = vst [vmem:[#allocation42_spill] sm:$0xff] %v2164_v51  ;;  %v2218_v51 = vld [vmem:[%s3023_s3 + $0x338] sm:$0xff]  ;;  %519 = vmatpush.msrb.mxu1 %v2207_v57 }
  0x72   :  { %3194 = vst [vmem:[#allocation43_spill] sm:$0xff] %v2170_v53  ;;  %v2236_v53 = vld [vmem:[%s3023_s3 + $0x218] sm:$0xff]  ;;  %578 = vmatpush.msrb.mxu2 %v2218_v51 }
  0x73   :  { %3195 = vst [vmem:[#allocation44_spill] sm:$0xff] %v2176_v46  ;;  %v2224_v46 = vld [vmem:[%s3023_s3 + $0x3c8] sm:$0xff]  ;;  %504 = vmatpush.msrb.mxu3 %v2236_v53 }
  0x74   :  { %3196 = vst [vmem:[#allocation45_spill] sm:$0xff] %v2183_v47  ;;  %v2231_v47 = vld [vmem:[%s3023_s3 + $0x2b8] sm:$0xff]  ;;  %596 = vmatpush.msrb.mxu0 %v2224_v46 }
  0x75   :  { %3197 = vst [vmem:[#allocation46_spill] sm:$0xff] %v2188_v40  ;;  %v2242_v40 = vld [vmem:[%s3023_s3 + $0x330] sm:$0xff]  ;;  %520 = vmatpush.msrb.mxu1 %v2231_v47 }
  0x76   :  { %3198 = vst [vmem:[#allocation47_spill] sm:$0xff] %v2194_v35  ;;  %579 = vmatpush.msrb.mxu2 %v2242_v40 }
  0x77   :  { %3199 = vst [vmem:[#allocation48_spill] sm:$0xff] %v2200_v43  ;;  %v2248_v43 = vld [vmem:[%s3023_s3 + $0x3c0] sm:$0xff] }
  0x78   :  { %3200 = vst [vmem:[#allocation49_spill] sm:$0xff] %v2207_v57  ;;  %v2255_v57 = vld [vmem:[%s3023_s3 + $0x2b0] sm:$0xff]  ;;  %597 = vmatpush.msrb.mxu0 %v2248_v43 }
  0x79   :  { %3201 = vst [vmem:[#allocation50_spill] sm:$0xff] %v2212_v39  ;;  %v2261_v39 = vld [vmem:[%s3023_s3 + $0x328] sm:$0xff]  ;;  %521 = vmatpush.msrb.mxu1 %v2255_v57 }
  0x7a   :  { %3202 = vst [vmem:[#allocation51_spill] sm:$0xff] %v2218_v51  ;;  %v2267_v51 = vld [vmem:[%s3023_s3 + $0x3b8] sm:$0xff]  ;;  %580 = vmatpush.msrb.mxu2 %v2261_v39 }
  0x7b   :  { %3203 = vst [vmem:[#allocation52_spill] sm:$0xff] %v2224_v46  ;;  %598 = vmatpush.msrb.mxu0 %v2267_v51 }
  0x7c   :  { %3204 = vst [vmem:[#allocation53_spill] sm:$0xff] %v2231_v47  ;;  %v2275_v47 = vld [vmem:[%s3023_s3 + $0x320] sm:$0xff] }
  0x7d   :  { %3205 = vst [vmem:[#allocation54_spill] sm:$0xff] %v2236_v53  ;;  %581 = vmatpush.msrb.mxu2 %v2275_v47  ;;  %v2283_v53 = vld [vmem:[%s3023_s3 + $0x210] sm:$0xff] }
  0x7e   :  { %3206 = vst [vmem:[#allocation55_spill] sm:$0xff] %v2242_v40  ;;  %505 = vmatpush.msrb.mxu3 %v2283_v53 }
  0x7f   :  { %3207 = vst [vmem:[#allocation56_spill] sm:$0xff] %v2248_v43  ;;  %v2293_v43 = vld [vmem:[%s3023_s3 + $0x318] sm:$0xff] }
  0x80   :  { %3208 = vst [vmem:[#allocation57_spill] sm:$0xff] %v2255_v57  ;;  %v2288_v57 = vld [vmem:[%s3023_s3 + $0x2a8] sm:$0xff]  ;;  %582 = vmatpush.msrb.mxu2 %v2293_v43 }
  0x81   :  { %3209 = vst [vmem:[#allocation58_spill] sm:$0xff] %v2261_v39  ;;  %522 = vmatpush.msrb.mxu1 %v2288_v57  ;;  %v2334_v39 = vld [vmem:[%s3023_s3 + $0x298] sm:$0xff] }
  0x82   :  { %3210 = vst [vmem:[#allocation59_spill] sm:$0xff] %v2267_v51  ;;  %v2300_v51 = vld [vmem:[%s3023_s3 + $0x3b0] sm:$0xff] }
  0x83   :  { %3211 = vst [vmem:[#allocation60_spill] sm:$0xff] %v2275_v47  ;;  %599 = vmatpush.msrb.mxu0 %v2300_v51  ;;  %v2307_v47 = vld [vmem:[%s3023_s3 + $0x208] sm:$0xff] }
  0x84   :  { %3212 = vst [vmem:[#allocation61_spill] sm:$0xff] %v2283_v53  ;;  %v2312_v53 = vld [vmem:[%s3023_s3 + $0x2a0] sm:$0xff]  ;;  %506 = vmatpush.msrb.mxu3 %v2307_v47 }
  0x85   :  { %3213 = vst [vmem:[#allocation62_spill] sm:$0xff] %v2288_v57  ;;  %v2317_v57 = vld [vmem:[%s3023_s3 + $0x310] sm:$0xff]  ;;  %523 = vmatpush.msrb.mxu1 %v2312_v53 }
  0x86   :  { %3214 = vst [vmem:[#allocation63_spill] sm:$0xff] %v2293_v43  ;;  %v2329_v43 = vld [vmem:[%s3023_s3 + $0x200] sm:$0xff]  ;;  %583 = vmatpush.msrb.mxu2 %v2317_v57 }
  0x87   :  { %3215 = vst [vmem:[#allocation64_spill] sm:$0xff] %v2300_v51  ;;  %v2324_v51 = vld [vmem:[%s3023_s3 + $0x3a8] sm:$0xff]  ;;  %507 = vmatpush.msrb.mxu3 %v2329_v43  ;;  %524 = vmatpush.msrb.mxu1 %v2334_v39 }
  0x88   :  { %3216 = vst [vmem:[#allocation65_spill] sm:$0xff] %v2307_v47  ;;  %600 = vmatpush.msrb.mxu0 %v2324_v51  ;;  %v2346_v47 = vld [vmem:[%s3023_s3 + $0x3a0] sm:$0xff] }
  0x89   :  { %3217 = vst [vmem:[#allocation66_spill] sm:$0xff] %v2312_v53  ;;  %v2341_v53 = vld [vmem:[%s3023_s3 + $0x308] sm:$0xff] }
  0x8a   :  { %3218 = vst [vmem:[#allocation67_spill] sm:$0xff] %v2317_v57  ;;  %584 = vmatpush.msrb.mxu2 %v2341_v53  ;;  %601 = vmatpush.msrb.mxu0 %v2346_v47  ;;  %v2360_v57 = vld [vmem:[%s3023_s3 + $0x300] sm:$0xff] }
  0x8b   :  { %3219 = vst [vmem:[#allocation68_spill] sm:$0xff] %v2324_v51  ;;  %v2355_v51 = vld [vmem:[%s3023_s3 + $0x290] sm:$0xff] }
  0x8c   :  { %3220 = vst [vmem:[#allocation69_spill] sm:$0xff] %v2329_v43  ;;  %v2365_v43 = vld [vmem:[%s3023_s3 + $0x398] sm:$0xff]  ;;  %525 = vmatpush.msrb.mxu1 %v2355_v51  ;;  %585 = vmatpush.msrb.mxu2 %v2360_v57 }
  0x8d   :  { %3221 = vst [vmem:[#allocation70_spill] sm:$0xff] %v2334_v39  ;;  %602 = vmatpush.msrb.mxu0 %v2365_v43 }
  0x8e   :  { %3222 = vst [vmem:[#allocation71_spill] sm:$0xff] %v2341_v53  ;;  %v2378_v53 = vld [vmem:[%s3023_s3 + $0x390] sm:$0xff] }
  0x8f   :  { %3223 = vst [vmem:[#allocation72_spill] sm:$0xff] %v2346_v47  ;;  %v2373_v47 = vld [vmem:[%s3023_s3 + $0x288] sm:$0xff]  ;;  %603 = vmatpush.msrb.mxu0 %v2378_v53 }
  0x90   :  { %3224 = vst [vmem:[#allocation73_spill] sm:$0xff] %v2355_v51  ;;  %526 = vmatpush.msrb.mxu1 %v2373_v47 }
  0x91   :  { %3225 = vst [vmem:[#allocation74_spill] sm:$0xff] %v2360_v57  ;;  %v2385_v57 = vld [vmem:[%s3023_s3 + $0x280] sm:$0xff] }
  0x92   :  { %3226 = vst [vmem:[#allocation75_spill] sm:$0xff] %v2365_v43  ;;  %v2390_v43 = vld [vmem:[%s3023_s3 + $0x388] sm:$0xff]  ;;  %527 = vmatpush.msrb.mxu1 %v2385_v57 }
  0x93   :  { %3227 = vst [vmem:[#allocation76_spill] sm:$0xff] %v2373_v47  ;;  %604 = vmatpush.msrb.mxu0 %v2390_v43  ;;  %v2397_v47 = vld [vmem:[%s3023_s3 + $0x380] sm:$0xff] }
  0x94   :  { %3228 = vst [vmem:[#allocation77_spill] sm:$0xff] %v2378_v53 }
  0x95   :  { %3229 = vst [vmem:[#allocation78_spill] sm:$0xff] %v2385_v57  ;;  %605 = vmatpush.msrb.mxu0 %v2397_v47  ;;  %v2408_v57 = vld [vmem:[%s3023_s3 + $0x478] sm:$0xff] }
  0x96   :  { %3230 = vst [vmem:[#allocation79_spill] sm:$0xff] %v2390_v43 }
  0x97   :  { %3231 = vst [vmem:[#allocation80_spill] sm:$0xff] %v2397_v47  ;;  %v2415_v47 = vld [vmem:[%s3023_s3 + $0x470] sm:$0xff] }
  0x98   :  { %3232 = vst [vmem:[#allocation81_spill] sm:$0xff] %v2408_v57 }
  0x99   :  { %3233 = vst [vmem:[#allocation82_spill] sm:$0xff] %v2415_v47 }
  0x9a   :  { %3235 = vst [vmem:[#allocation84_spill] sm:$0xff] %v2427_v50 }
  0x9e   :  { %v158_v53 = vpop.f32.mrf.mxu0 }
  0xa0   :  { %v2400_v51 = vpop.permute.xlu0 %134 }
  0xa1   :  { %v159_v39 = vadd.f32 %v158_v53, %v2400_v51  ;;  %v178_v46 = vpop.f32.mrf.mxu1 }
  0xa3   :  { %v2403_v40 = vadd.f32 %v178_v46, %v159_v39  ;;  %v2420_v39 = vld [vmem:[%s3023_s3 + $0x578] sm:$0xff] }
  0xa4   :  { %3234 = vst [vmem:[#allocation83_spill] sm:$0xff] %v2420_v39 }
  0xa5   :  { %350 = vmatmul.f32.vlgmr.msra.gmra.mxu3 %v2403_v40  ;;  %v198_v43 = vpop.f32.mrf.mxu2  ;;  %v410_v35 = vrot.slane %v2403_v40, 1 }
  0xa6   :  { %648 = vmatpush.msra.mxu3 %v2408_v57  ;;  %v199_v46 = vadd.f32 %v198_v43, %v2400_v51  ;;  %v218_v53 = vpop.f32.mrf.mxu3  ;;  %v2446_v43 = vld [vmem:[%s3023_s3 + $0x4f8] sm:$0xff]  ;;  %v2486_v57 = vld [vmem:[%s3023_s3 + $0x450] sm:$0xff] }
  0xa7   :  { %430 = vmatmul.f32.vlgmr.msra.gmra.mxu2 %v410_v35  ;;  %v2441_v35 = vld [vmem:[%s3023_s3 + $0x460] sm:$0xff]  ;;  %3238 = vst [vmem:[#allocation87_spill] sm:$0xff] %v2446_v43 }
  0xa8   :  { %649 = vmatpush.msra.mxu3 %v2415_v47  ;;  %726 = vmatpush.msra.mxu2 %v2420_v39  ;;  %v2436_v31 = vadd.f32 %v218_v53, %v199_v46  ;;  %3237 = vst [vmem:[#allocation86_spill] sm:$0xff] %v2441_v35  ;;  %v2453_v39 = vld [vmem:[%s3023_s3 + $0x568] sm:$0xff]  ;;  %v2460_v53 = vld [vmem:[%s3023_s3 + $0x4f0] sm:$0xff]  ;;  %v2473_v47 = vld [vmem:[%s3023_s3 + $0x560] sm:$0xff] }
  0xa9   :  { %3239 = vst [vmem:[#allocation88_spill] sm:$0xff] %v2453_v39 }
  0xaa   :  { %650 = vmatpush.msra.mxu3 %v2427_v50  ;;  %727 = vmatpush.msra.mxu2 %v2432_v34  ;;  %v411_v46 = vrot.slane %v2436_v31, 1  ;;  %3240 = vst [vmem:[#allocation89_spill] sm:$0xff] %v2460_v53  ;;  %v488_v34 = vrot.slane %v2403_v40, 2  ;;  %v2468_v50 = vld [vmem:[%s3023_s3 + $0x458] sm:$0xff] }
  0xab   :  { %370 = vmatmul.f32.vlgmr.msra.gmra.mxu1 %v2436_v31  ;;  %3241 = vst [vmem:[#allocation90_spill] sm:$0xff] %v2468_v50 }
  0xac   :  { %651 = vmatpush.msra.mxu3 %v2441_v35  ;;  %668 = vmatpush.msra.mxu1 %v2446_v43  ;;  %3242 = vst [vmem:[#allocation91_spill] sm:$0xff] %v2473_v47  ;;  %v2479_v35 = vld [vmem:[%s3023_s3 + $0x5f8] sm:$0xff]  ;;  %v566_v43 = vrot.slane %v2403_v40, 3 }
  0xad   :  { %728 = vmatpush.msra.mxu2 %v2453_v39  ;;  %450 = vmatmul.f32.vlgmr.msra.gmra.mxu0 %v411_v46  ;;  %3243 = vst [vmem:[#allocation92_spill] sm:$0xff] %v2479_v35  ;;  %v2491_v39 = vld [vmem:[%s3023_s3 + $0x4e8] sm:$0xff]  ;;  %v2503_v46 = vld [vmem:[%s3023_s3 + $0x5f0] sm:$0xff] }
  0xae   :  { %508 = vmatmul.f32.vlgmr.msrb.gmra.mxu3 %v488_v34  ;;  %669 = vmatpush.msra.mxu1 %v2460_v53  ;;  %3244 = vst [vmem:[#allocation93_spill] sm:$0xff] %v2486_v57  ;;  %v2498_v34 = vld [vmem:[%s3023_s3 + $0x558] sm:$0xff]  ;;  %v2509_v53 = vld [vmem:[%s3023_s3 + $0x448] sm:$0xff] }
  0xaf   :  { %3245 = vst [vmem:[#allocation94_spill] sm:$0xff] %v2491_v39  ;;  %652 = vmatpush.msra.mxu3 %v2468_v50  ;;  %729 = vmatpush.msra.mxu2 %v2473_v47  ;;  %v2514_v47 = vld [vmem:[%s3023_s3 + $0x4e0] sm:$0xff]  ;;  %v2521_v50 = vld [vmem:[%s3023_s3 + $0x550] sm:$0xff] }
  0xb0   :  { %3246 = vst [vmem:[#allocation95_spill] sm:$0xff] %v2498_v34  ;;  %746 = vmatpush.msra.mxu0 %v2479_v35  ;;  %586 = vmatmul.f32.vlgmr.msrb.gmra.mxu2 %v566_v43  ;;  %v2526_v43 = vld [vmem:[%s3023_s3 + $0x5e8] sm:$0xff]  ;;  %v2541_v35 = vld [vmem:[%s3023_s3 + $0x4d8] sm:$0xff] }
  0xb1   :  { %3247 = vst [vmem:[#allocation96_spill] sm:$0xff] %v2503_v46  ;;  %653 = vmatpush.msra.mxu3 %v2486_v57  ;;  %670 = vmatpush.msra.mxu1 %v2491_v39  ;;  %v2533_v57 = vld [vmem:[%s3023_s3 + $0x440] sm:$0xff]  ;;  %v489_v39 = vrot.slane %v2436_v31, 2 }
  0xb2   :  { %3248 = vst [vmem:[#allocation97_spill] sm:$0xff] %v2509_v53  ;;  %730 = vmatpush.msra.mxu2 %v2498_v34  ;;  %747 = vmatpush.msra.mxu0 %v2503_v46  ;;  %v2546_v46 = vld [vmem:[%s3023_s3 + $0x548] sm:$0xff]  ;;  %v2564_v34 = vld [vmem:[%s3023_s3 + $0x4d0] sm:$0xff] }
  0xb3   :  { %3249 = vst [vmem:[#allocation98_spill] sm:$0xff] %v2514_v47  ;;  %654 = vmatpush.msra.mxu3 %v2509_v53  ;;  %671 = vmatpush.msra.mxu1 %v2514_v47  ;;  %v2553_v47 = vld [vmem:[%s3023_s3 + $0x5e0] sm:$0xff]  ;;  %v2558_v53 = vld [vmem:[%s3023_s3 + $0x438] sm:$0xff] }
  0xb4   :  { %3250 = vst [vmem:[#allocation99_spill] sm:$0xff] %v2521_v50  ;;  %731 = vmatpush.msra.mxu2 %v2521_v50  ;;  %748 = vmatpush.msra.mxu0 %v2526_v43  ;;  %v2572_v50 = vld [vmem:[%s3023_s3 + $0x540] sm:$0xff] }
  0xb5   :  { %3251 = vst [vmem:[#allocation100_spill] sm:$0xff] %v2526_v43  ;;  %528 = vmatmul.f32.vlgmr.msrb.gmra.mxu1 %v489_v39  ;;  %655 = vmatpush.msra.mxu3 %v2533_v57  ;;  %v567_v43 = vrot.slane %v2436_v31, 3  ;;  %v2577_v39 = vld [vmem:[%s3023_s3 + $0x5d8] sm:$0xff] }
  0xb6   :  { %3252 = vst [vmem:[#allocation101_spill] sm:$0xff] %v2533_v57  ;;  %672 = vmatpush.msra.mxu1 %v2541_v35  ;;  %732 = vmatpush.msra.mxu2 %v2546_v46  ;;  %v2595_v57 = vld [vmem:[%s3023_s3 + $0x538] sm:$0xff] }
  0xb7   :  { %3253 = vst [vmem:[#allocation102_spill] sm:$0xff] %v2541_v35  ;;  %749 = vmatpush.msra.mxu0 %v2553_v47  ;;  %656 = vmatpush.msra.mxu3 %v2558_v53  ;;  %v2589_v35 = vld [vmem:[%s3023_s3 + $0x4c8] sm:$0xff] }
  0xb8   :  { %3254 = vst [vmem:[#allocation103_spill] sm:$0xff] %v2546_v46  ;;  %v2584_v46 = vld [vmem:[%s3023_s3 + $0x430] sm:$0xff]  ;;  %606 = vmatmul.f32.vlgmr.msrb.gmra.mxu0 %v567_v43  ;;  %673 = vmatpush.msra.mxu1 %v2564_v34  ;;  %v2607_v43 = vld [vmem:[%s3023_s3 + $0x428] sm:$0xff] }
  0xb9   :  { %3255 = vst [vmem:[#allocation104_spill] sm:$0xff] %v2553_v47  ;;  %733 = vmatpush.msra.mxu2 %v2572_v50  ;;  %750 = vmatpush.msra.mxu0 %v2577_v39  ;;  %v2759_v47 = vld [vmem:[%s3023_s3 + $0x500] sm:$0xff] }
  0xba   :  { %3256 = vst [vmem:[#allocation105_spill] sm:$0xff] %v2558_v53  ;;  %v2600_v53 = vld [vmem:[%s3023_s3 + $0x5d0] sm:$0xff]  ;;  %657 = vmatpush.msra.mxu3 %v2584_v46  ;;  %674 = vmatpush.msra.mxu1 %v2589_v35 }
  0xbb   :  { %3257 = vst [vmem:[#allocation106_spill] sm:$0xff] %v2564_v34  ;;  %v2612_v34 = vld [vmem:[%s3023_s3 + $0x4c0] sm:$0xff]  ;;  %734 = vmatpush.msra.mxu2 %v2595_v57  ;;  %751 = vmatpush.msra.mxu0 %v2600_v53 }
  0xbc   :  { %3258 = vst [vmem:[#allocation107_spill] sm:$0xff] %v2572_v50  ;;  %v2619_v50 = vld [vmem:[%s3023_s3 + $0x530] sm:$0xff]  ;;  %658 = vmatpush.msra.mxu3 %v2607_v43  ;;  %675 = vmatpush.msra.mxu1 %v2612_v34 }
  0xbd   :  { %3259 = vst [vmem:[#allocation108_spill] sm:$0xff] %v2577_v39  ;;  %v2624_v39 = vld [vmem:[%s3023_s3 + $0x5c8] sm:$0xff]  ;;  %735 = vmatpush.msra.mxu2 %v2619_v50 }
  0xbe   :  { %3260 = vst [vmem:[#allocation109_spill] sm:$0xff] %v2584_v46  ;;  %v2631_v46 = vld [vmem:[%s3023_s3 + $0x420] sm:$0xff]  ;;  %752 = vmatpush.msra.mxu0 %v2624_v39 }
  0xbf   :  { %3261 = vst [vmem:[#allocation110_spill] sm:$0xff] %v2589_v35  ;;  %v2636_v35 = vld [vmem:[%s3023_s3 + $0x4b8] sm:$0xff]  ;;  %659 = vmatpush.msra.mxu3 %v2631_v46 }
  0xc0   :  { %3262 = vst [vmem:[#allocation111_spill] sm:$0xff] %v2595_v57  ;;  %v2643_v57 = vld [vmem:[%s3023_s3 + $0x528] sm:$0xff]  ;;  %676 = vmatpush.msra.mxu1 %v2636_v35 }
  0xc1   :  { %3263 = vst [vmem:[#allocation112_spill] sm:$0xff] %v2600_v53  ;;  %v2648_v53 = vld [vmem:[%s3023_s3 + $0x5c0] sm:$0xff]  ;;  %736 = vmatpush.msra.mxu2 %v2643_v57 }
  0xc2   :  { %3264 = vst [vmem:[#allocation113_spill] sm:$0xff] %v2607_v43  ;;  %v2655_v43 = vld [vmem:[%s3023_s3 + $0x418] sm:$0xff]  ;;  %753 = vmatpush.msra.mxu0 %v2648_v53 }
  0xc3   :  { %3265 = vst [vmem:[#allocation114_spill] sm:$0xff] %v2612_v34  ;;  %v2660_v34 = vld [vmem:[%s3023_s3 + $0x4b0] sm:$0xff]  ;;  %660 = vmatpush.msra.mxu3 %v2655_v43 }
  0xc4   :  { %3266 = vst [vmem:[#allocation115_spill] sm:$0xff] %v2619_v50  ;;  %v2667_v50 = vld [vmem:[%s3023_s3 + $0x520] sm:$0xff]  ;;  %677 = vmatpush.msra.mxu1 %v2660_v34 }
  0xc5   :  { %3267 = vst [vmem:[#allocation116_spill] sm:$0xff] %v2624_v39  ;;  %v2672_v39 = vld [vmem:[%s3023_s3 + $0x5b8] sm:$0xff]  ;;  %737 = vmatpush.msra.mxu2 %v2667_v50 }
  0xc6   :  { %3268 = vst [vmem:[#allocation117_spill] sm:$0xff] %v2631_v46  ;;  %v2679_v46 = vld [vmem:[%s3023_s3 + $0x410] sm:$0xff]  ;;  %754 = vmatpush.msra.mxu0 %v2672_v39 }
  0xc7   :  { %3269 = vst [vmem:[#allocation118_spill] sm:$0xff] %v2636_v35  ;;  %v2684_v35 = vld [vmem:[%s3023_s3 + $0x4a8] sm:$0xff]  ;;  %661 = vmatpush.msra.mxu3 %v2679_v46 }
  0xc8   :  { %3270 = vst [vmem:[#allocation119_spill] sm:$0xff] %v2643_v57  ;;  %v2691_v57 = vld [vmem:[%s3023_s3 + $0x518] sm:$0xff]  ;;  %678 = vmatpush.msra.mxu1 %v2684_v35 }
  0xc9   :  { %3271 = vst [vmem:[#allocation120_spill] sm:$0xff] %v2648_v53  ;;  %v2696_v53 = vld [vmem:[%s3023_s3 + $0x5b0] sm:$0xff]  ;;  %738 = vmatpush.msra.mxu2 %v2691_v57 }
  0xca   :  { %3272 = vst [vmem:[#allocation121_spill] sm:$0xff] %v2655_v43  ;;  %v2703_v43 = vld [vmem:[%s3023_s3 + $0x408] sm:$0xff]  ;;  %755 = vmatpush.msra.mxu0 %v2696_v53 }
  0xcb   :  { %3273 = vst [vmem:[#allocation122_spill] sm:$0xff] %v2660_v34  ;;  %v2708_v34 = vld [vmem:[%s3023_s3 + $0x4a0] sm:$0xff]  ;;  %662 = vmatpush.msra.mxu3 %v2703_v43 }
  0xcc   :  { %3274 = vst [vmem:[#allocation123_spill] sm:$0xff] %v2667_v50  ;;  %v2715_v50 = vld [vmem:[%s3023_s3 + $0x510] sm:$0xff]  ;;  %679 = vmatpush.msra.mxu1 %v2708_v34 }
  0xcd   :  { %3275 = vst [vmem:[#allocation124_spill] sm:$0xff] %v2672_v39  ;;  %v2720_v39 = vld [vmem:[%s3023_s3 + $0x5a8] sm:$0xff]  ;;  %739 = vmatpush.msra.mxu2 %v2715_v50 }
  0xce   :  { %3276 = vst [vmem:[#allocation125_spill] sm:$0xff] %v2679_v46  ;;  %v2727_v46 = vld [vmem:[%s3023_s3 + $0x400] sm:$0xff]  ;;  %756 = vmatpush.msra.mxu0 %v2720_v39 }
  0xcf   :  { %3277 = vst [vmem:[#allocation126_spill] sm:$0xff] %v2684_v35  ;;  %v2732_v35 = vld [vmem:[%s3023_s3 + $0x498] sm:$0xff]  ;;  %663 = vmatpush.msra.mxu3 %v2727_v46 }
  0xd0   :  { %3278 = vst [vmem:[#allocation127_spill] sm:$0xff] %v2691_v57  ;;  %v2739_v57 = vld [vmem:[%s3023_s3 + $0x508] sm:$0xff]  ;;  %680 = vmatpush.msra.mxu1 %v2732_v35 }
  0xd1   :  { %3279 = vst [vmem:[#allocation128_spill] sm:$0xff] %v2696_v53  ;;  %v2744_v53 = vld [vmem:[%s3023_s3 + $0x5a0] sm:$0xff]  ;;  %740 = vmatpush.msra.mxu2 %v2739_v57  ;;  %767 = vmatpush.msrb.mxu3 %v1599_v38 }
  0xd2   :  { %3280 = vst [vmem:[#allocation129_spill] sm:$0xff] %v2703_v43  ;;  %v2751_v43 = vld [vmem:[%s3023_s3 + $0x490] sm:$0xff]  ;;  %757 = vmatpush.msra.mxu0 %v2744_v53  ;;  %v2788_v38 = vld [vmem:[%s3023_s3 + $0x480] sm:$0xff] }
  0xd3   :  { %3281 = vst [vmem:[#allocation130_spill] sm:$0xff] %v2708_v34  ;;  %v644_v34 = vrot.slane %v2403_v40, 4  ;;  %681 = vmatpush.msra.mxu1 %v2751_v43  ;;  %741 = vmatpush.msra.mxu2 %v2759_v47 }
  0xd4   :  { %3282 = vst [vmem:[#allocation131_spill] sm:$0xff] %v2720_v39  ;;  %v2766_v39 = vld [vmem:[%s3023_s3 + $0x598] sm:$0xff]  ;;  %768 = vmatpush.msrb.mxu3 %v1612_v41  ;;  %v645_v41 = vrot.slane %v2436_v31, 4 }
  0xd5   :  { %3283 = vst [vmem:[#allocation132_spill] sm:$0xff] %v2732_v35  ;;  %664 = vmatmul.f32.vlgmr.msra.gmra.mxu3 %v644_v34  ;;  %v722_v35 = vrot.slane %v2403_v40, 5  ;;  %758 = vmatpush.msra.mxu0 %v2766_v39  ;;  %v2793_v40 = vld [vmem:[%s3023_s3 + $0x588] sm:$0xff] }
  0xd6   :  { %3284 = vst [vmem:[#allocation133_spill] sm:$0xff] %v2739_v57  ;;  %v2775_v57 = vld [vmem:[%s3023_s3 + $0x488] sm:$0xff]  ;;  %814 = vmatpush.msrb.mxu2 %v1668_v54  ;;  %769 = vmatpush.msrb.mxu3 %v1624_v44  ;;  %v2805_v54 = vld [vmem:[%s3023_s3 + $0x580] sm:$0xff]  ;;  %v723_v44 = vrot.slane %v2436_v31, 5 }
  0xd7   :  { %3285 = vst [vmem:[#allocation134_spill] sm:$0xff] %v2744_v53  ;;  %v2780_v53 = vld [vmem:[%s3023_s3 + $0x590] sm:$0xff]  ;;  %742 = vmatmul.f32.vlgmr.msra.gmra.mxu2 %v722_v35  ;;  %682 = vmatpush.msra.mxu1 %v2775_v57  ;;  %v3319_v31 = vld [vmem:[#allocation37_spill] sm:$0xff] }
  0xd8   :  { %759 = vmatpush.msra.mxu0 %v2780_v53  ;;  %815 = vmatpush.msrb.mxu2 %v1690_v58  ;;  %v3287_v58 = vld [vmem:[#allocation6_spill] sm:$0xff]  ;;  %v3327_v34 = vld [vmem:[#allocation45_spill] sm:$0xff] }
  0xd9   :  { %683 = vmatpush.msra.mxu1 %v2788_v38  ;;  %770 = vmatpush.msrb.mxu3 %v1642_v48  ;;  %v3326_v35 = vld [vmem:[#allocation42_spill] sm:$0xff] }
  0xda   :  { %760 = vmatpush.msra.mxu0 %v2793_v40  ;;  %684 = vmatmul.f32.vlgmr.msra.gmra.mxu1 %v645_v41  ;;  %v3328_v41 = vld [vmem:[#allocation51_spill] sm:$0xff] }
  0xdb   :  { %787 = vmatpush.msrb.mxu1 %v1629_v45  ;;  %816 = vmatpush.msrb.mxu2 %v1702_v60  ;;  %v238_v45 = vpop.f32.mrf.mxu1  ;;  %v3289_v60 = vld [vmem:[#allocation10_spill] sm:$0xff] }
  0xdc   :  { %761 = vmatpush.msra.mxu0 %v2805_v54  ;;  %771 = vmatpush.msrb.mxu3 %v1660_v52  ;;  %v239_v48 = vadd.f32 %v238_v45, %v2400_v51  ;;  %v3330_v45 = vld [vmem:[#allocation46_spill] sm:$0xff] }
  0xdd   :  { %762 = vmatmul.f32.vlgmr.msra.gmra.mxu0 %v723_v44  ;;  %788 = vmatpush.msrb.mxu1 %v1647_v49  ;;  %v258_v49 = vpop.f32.mrf.mxu3  ;;  %v3329_v44 = vld [vmem:[#allocation48_spill] sm:$0xff] }
  0xde   :  { %817 = vmatpush.msrb.mxu2 %v1726_v1  ;;  %834 = vmatpush.msrb.mxu0 %v1707_v62  ;;  %v2853_v52 = vadd.f32 %v258_v49, %v239_v48  ;;  %v298_v1 = vpop.f32.mrf.mxu2  ;;  %v3331_v48 = vld [vmem:[#allocation49_spill] sm:$0xff]  ;;  %v3332_v49 = vld [vmem:[#allocation55_spill] sm:$0xff] }
  0xdf   :  { %772 = vmatpush.msrb.mxu3 %v1675_v55  ;;  %789 = vmatpush.msrb.mxu1 %v1680_v56  ;;  %v278_v55 = vpop.f32.mrf.mxu0  ;;  %v3286_v56 = vld [vmem:[#allocation5_spill] sm:$0xff] }
  0xe0   :  { %818 = vmatpush.msrb.mxu2 %v1749_v4  ;;  %835 = vmatpush.msrb.mxu0 %v1731_v2  ;;  %v279_v62 = vadd.f32 %v278_v55, %v2400_v51  ;;  %v3291_v2 = vld [vmem:[#allocation7_spill] sm:$0xff]  ;;  %v3294_v4 = vld [vmem:[#allocation9_spill] sm:$0xff]  ;;  %v3325_v51 = vld [vmem:[#allocation44_spill] sm:$0xff] }
  0xe1   :  { %773 = vmatpush.msrb.mxu3 %v1697_v59  ;;  %790 = vmatpush.msrb.mxu1 %v1715_v63  ;;  %v3288_v59 = vld [vmem:[#allocation13_spill] sm:$0xff]  ;;  %v3290_v63 = vld [vmem:[#allocation8_spill] sm:$0xff] }
  0xe2   :  { %819 = vmatpush.msrb.mxu2 %v1773_v8  ;;  %836 = vmatpush.msrb.mxu0 %v1755_v5  ;;  %v3295_v5 = vld [vmem:[#allocation19_spill] sm:$0xff]  ;;  %v3297_v8 = vld [vmem:[#allocation18_spill] sm:$0xff]  ;;  %v3333_v55 = vld [vmem:[#allocation52_spill] sm:$0xff] }
  0xe3   :  { %774 = vmatpush.msrb.mxu3 %v1720_v0  ;;  %791 = vmatpush.msrb.mxu1 %v1739_v61  ;;  %v810_v0 = vrot.slane %v2853_v52, 1  ;;  %v3292_v61 = vld [vmem:[#allocation17_spill] sm:$0xff] }
  0xe4   :  { %820 = vmatpush.msrb.mxu2 %v1797_v12  ;;  %837 = vmatpush.msrb.mxu0 %v1779_v9  ;;  %v3298_v9 = vld [vmem:[#allocation12_spill] sm:$0xff]  ;;  %v3301_v12 = vld [vmem:[#allocation21_spill] sm:$0xff] }
  0xe5   :  { %775 = vmatpush.msrb.mxu3 %v1744_v3  ;;  %792 = vmatpush.msrb.mxu1 %v1763_v6  ;;  %v3293_v3 = vld [vmem:[#allocation14_spill] sm:$0xff]  ;;  %v2872_v6 = vadd.f32 %v298_v1, %v279_v62  ;;  %v3341_v1 = vld [vmem:[#allocation59_spill] sm:$0xff] }
  0xe6   :  { %821 = vmatpush.msrb.mxu2 %v1821_v16  ;;  %838 = vmatpush.msrb.mxu0 %v1803_v13  ;;  %v3302_v13 = vld [vmem:[#allocation16_spill] sm:$0xff]  ;;  %v3338_v62 = vld [vmem:[#allocation54_spill] sm:$0xff] }
  0xe7   :  { %776 = vmatpush.msrb.mxu3 %v1768_v7  ;;  %793 = vmatpush.msrb.mxu1 %v1787_v10  ;;  %v3296_v7 = vld [vmem:[#allocation11_spill] sm:$0xff]  ;;  %v811_v16 = vrot.slane %v2872_v6, 1 }
  0xe8   :  { %822 = vmatpush.msrb.mxu2 %v1845_v20  ;;  %839 = vmatpush.msrb.mxu0 %v1827_v17  ;;  %v3299_v10 = vld [vmem:[#allocation23_spill] sm:$0xff]  ;;  %v3305_v17 = vld [vmem:[#allocation25_spill] sm:$0xff] }
  0xe9   :  { %777 = vmatpush.msrb.mxu3 %v1792_v11  ;;  %794 = vmatpush.msrb.mxu1 %v1811_v14  ;;  %v3300_v11 = vld [vmem:[#allocation15_spill] sm:$0xff]  ;;  %v3303_v14 = vld [vmem:[#allocation20_spill] sm:$0xff] }
  0xea   :  { %823 = vmatpush.msrb.mxu2 %v1869_v24  ;;  %840 = vmatpush.msrb.mxu0 %v1851_v21  ;;  %v3308_v20 = vld [vmem:[#allocation31_spill] sm:$0xff]  ;;  %v3309_v21 = vld [vmem:[#allocation28_spill] sm:$0xff] }
  0xeb   :  { %778 = vmatpush.msrb.mxu3 %v1816_v15  ;;  %795 = vmatpush.msrb.mxu1 %v1835_v18  ;;  %v3304_v15 = vld [vmem:[#allocation27_spill] sm:$0xff]  ;;  %v3306_v18 = vld [vmem:[#allocation22_spill] sm:$0xff] }
  0xec   :  { %824 = vmatpush.msrb.mxu2 %v1893_v28  ;;  %841 = vmatpush.msrb.mxu0 %v1875_v25  ;;  %v3312_v24 = vld [vmem:[#allocation35_spill] sm:$0xff]  ;;  %v3313_v25 = vld [vmem:[#allocation32_spill] sm:$0xff] }
  0xed   :  { %779 = vmatpush.msrb.mxu3 %v1840_v19  ;;  %796 = vmatpush.msrb.mxu1 %v1859_v22  ;;  %v3307_v19 = vld [vmem:[#allocation24_spill] sm:$0xff]  ;;  %v3310_v22 = vld [vmem:[#allocation26_spill] sm:$0xff]  ;;  %v3316_v28 = vld [vmem:[#allocation39_spill] sm:$0xff] }
  0xee   :  { %825 = vmatpush.msrb.mxu2 %v1917_v32  ;;  %842 = vmatpush.msrb.mxu0 %v1899_v29  ;;  %v3317_v29 = vld [vmem:[#allocation36_spill] sm:$0xff]  ;;  %v3320_v32 = vld [vmem:[#allocation43_spill] sm:$0xff] }
  0xef   :  { %780 = vmatpush.msrb.mxu3 %v1864_v23  ;;  %797 = vmatpush.msrb.mxu1 %v1883_v26  ;;  %v3311_v23 = vld [vmem:[#allocation29_spill] sm:$0xff]  ;;  %v3314_v26 = vld [vmem:[#allocation30_spill] sm:$0xff] }
  0xf0   :  { %826 = vmatpush.msrb.mxu2 %v1941_v36  ;;  %843 = vmatpush.msrb.mxu0 %v1923_v33  ;;  %v3321_v33 = vld [vmem:[#allocation40_spill] sm:$0xff]  ;;  %v3322_v36 = vld [vmem:[#allocation38_spill] sm:$0xff] }
  0xf1   :  { %781 = vmatpush.msrb.mxu3 %v1888_v27  ;;  %798 = vmatpush.msrb.mxu1 %v1907_v30  ;;  %v3315_v27 = vld [vmem:[#allocation33_spill] sm:$0xff]  ;;  %v3318_v30 = vld [vmem:[#allocation34_spill] sm:$0xff] }
  0xf2   :  { %827 = vmatpush.msrb.mxu2 %v1965_v42  ;;  %844 = vmatpush.msrb.mxu0 %v1947_v37  ;;  %v3323_v37 = vld [vmem:[#allocation41_spill] sm:$0xff]  ;;  %v3324_v42 = vld [vmem:[#allocation47_spill] sm:$0xff] }
  0xf3   :  { %782 = vmatpush.msrb.mxu3 %v3286_v56  ;;  %799 = vmatpush.msrb.mxu1 %v3287_v58  ;;  %v3334_v56 = vld [vmem:[#allocation50_spill] sm:$0xff]  ;;  %v3335_v58 = vld [vmem:[#allocation53_spill] sm:$0xff] }
  0xf4   :  { %828 = vmatpush.msrb.mxu2 %v3288_v59  ;;  %845 = vmatpush.msrb.mxu0 %v3289_v60  ;;  %v3336_v59 = vld [vmem:[#allocation58_spill] sm:$0xff]  ;;  %v3337_v60 = vld [vmem:[#allocation56_spill] sm:$0xff] }
  0xf5   :  { %783 = vmatmul.f32.vlgmr.msrb.gmra.mxu3 %v2853_v52  ;;  %800 = vmatpush.msrb.mxu1 %v3290_v63  ;;  %v3339_v63 = vld [vmem:[#allocation57_spill] sm:$0xff] }
  0xf6   :  { %859 = vmatpush.msra.mxu3 %v3291_v2  ;;  %829 = vmatpush.msrb.mxu2 %v3292_v61  ;;  %v3342_v2 = vld [vmem:[#allocation61_spill] sm:$0xff]  ;;  %v3343_v61 = vld [vmem:[#allocation62_spill] sm:$0xff] }
  0xf7   :  { %846 = vmatpush.msrb.mxu0 %v3293_v3  ;;  %830 = vmatmul.f32.vlgmr.msrb.gmra.mxu2 %v810_v0  ;;  %v3340_v0 = vld [vmem:[#allocation60_spill] sm:$0xff]  ;;  %v3344_v3 = vld [vmem:[#allocation63_spill] sm:$0xff] }
  0xf8   :  { %860 = vmatpush.msra.mxu3 %v3294_v4  ;;  %904 = vmatpush.msra.mxu2 %v3295_v5  ;;  %v3345_v4 = vld [vmem:[#allocation64_spill] sm:$0xff]  ;;  %v3346_v5 = vld [vmem:[#allocation65_spill] sm:$0xff] }
  0xf9   :  { %801 = vmatpush.msrb.mxu1 %v3296_v7  ;;  %847 = vmatpush.msrb.mxu0 %v3297_v8  ;;  %v3347_v7 = vld [vmem:[#allocation66_spill] sm:$0xff]  ;;  %v3348_v8 = vld [vmem:[#allocation67_spill] sm:$0xff] }
  0xfa   :  { %861 = vmatpush.msra.mxu3 %v3298_v9  ;;  %905 = vmatpush.msra.mxu2 %v3299_v10  ;;  %v3349_v9 = vld [vmem:[#allocation68_spill] sm:$0xff]  ;;  %v3350_v10 = vld [vmem:[#allocation69_spill] sm:$0xff] }
  0xfb   :  { %802 = vmatpush.msrb.mxu1 %v3300_v11  ;;  %848 = vmatpush.msrb.mxu0 %v3301_v12  ;;  %v3351_v11 = vld [vmem:[#allocation70_spill] sm:$0xff]  ;;  %v855_v12 = vrot.slane %v2853_v52, 2 }
  0xfc   :  { %803 = vmatmul.f32.vlgmr.msrb.gmra.mxu1 %v2872_v6  ;;  %862 = vmatpush.msra.mxu3 %v3302_v13  ;;  %v3352_v13 = vld [vmem:[#allocation71_spill] sm:$0xff] }
  0xfd   :  { %879 = vmatpush.msra.mxu1 %v3303_v14  ;;  %906 = vmatpush.msra.mxu2 %v3304_v15  ;;  %v3353_v14 = vld [vmem:[#allocation72_spill] sm:$0xff]  ;;  %v3354_v15 = vld [vmem:[#allocation73_spill] sm:$0xff] }
  0xfe   :  { %849 = vmatpush.msrb.mxu0 %v3305_v17  ;;  %863 = vmatpush.msra.mxu3 %v3306_v18  ;;  %v3355_v17 = vld [vmem:[#allocation81_spill] sm:$0xff]  ;;  %v3356_v18 = vld [vmem:[#allocation74_spill] sm:$0xff] }
  0xff   :  { %850 = vmatmul.f32.vlgmr.msrb.gmra.mxu0 %v811_v16  ;;  %880 = vmatpush.msra.mxu1 %v3307_v19  ;;  %v900_v16 = vrot.slane %v2853_v52, 3  ;;  %v3357_v19 = vld [vmem:[#allocation75_spill] sm:$0xff] }
 0x100   :  { %907 = vmatpush.msra.mxu2 %v3308_v20  ;;  %924 = vmatpush.msra.mxu0 %v3309_v21  ;;  %v3358_v20 = vld [vmem:[#allocation82_spill] sm:$0xff]  ;;  %v3359_v21 = vld [vmem:[#allocation83_spill] sm:$0xff] }
 0x101   :  { %864 = vmatpush.msra.mxu3 %v3310_v22  ;;  %881 = vmatpush.msra.mxu1 %v3311_v23  ;;  %v3360_v22 = vld [vmem:[#allocation76_spill] sm:$0xff]  ;;  %v3361_v23 = vld [vmem:[#allocation77_spill] sm:$0xff] }
 0x102   :  { %908 = vmatpush.msra.mxu2 %v3312_v24  ;;  %925 = vmatpush.msra.mxu0 %v3313_v25  ;;  %v3362_v24 = vld [vmem:[#allocation84_spill] sm:$0xff]  ;;  %v3363_v25 = vld [vmem:[#allocation85_spill] sm:$0xff] }
 0x103   :  { %865 = vmatpush.msra.mxu3 %v3314_v26  ;;  %882 = vmatpush.msra.mxu1 %v3315_v27  ;;  %v856_v26 = vrot.slane %v2872_v6, 2  ;;  %v3364_v27 = vld [vmem:[#allocation78_spill] sm:$0xff] }
 0x104   :  { %909 = vmatpush.msra.mxu2 %v3316_v28  ;;  %926 = vmatpush.msra.mxu0 %v3317_v29  ;;  %v3365_v28 = vld [vmem:[#allocation79_spill] sm:$0xff]  ;;  %v3366_v29 = vld [vmem:[#allocation86_spill] sm:$0xff] }
 0x105   :  { %866 = vmatpush.msra.mxu3 %v3318_v30  ;;  %883 = vmatpush.msra.mxu1 %v3319_v31  ;;  %v3367_v30 = vld [vmem:[#allocation87_spill] sm:$0xff]  ;;  %v3368_v31 = vld [vmem:[#allocation88_spill] sm:$0xff] }
 0x106   :  { %910 = vmatpush.msra.mxu2 %v3320_v32  ;;  %927 = vmatpush.msra.mxu0 %v3321_v33  ;;  %v901_v32 = vrot.slane %v2872_v6, 3  ;;  %v3369_v33 = vld [vmem:[#allocation80_spill] sm:$0xff] }
 0x107   :  { %867 = vmatpush.msra.mxu3 %v3322_v36  ;;  %884 = vmatpush.msra.mxu1 %v3323_v37  ;;  %v3370_v36 = vld [vmem:[#allocation90_spill] sm:$0xff]  ;;  %v3371_v37 = vld [vmem:[#allocation89_spill] sm:$0xff] }
 0x108   :  { %911 = vmatpush.msra.mxu2 %v3324_v42  ;;  %928 = vmatpush.msra.mxu0 %v3325_v51  ;;  %v3372_v42 = vld [vmem:[#allocation91_spill] sm:$0xff]  ;;  %v3373_v51 = vld [vmem:[#allocation92_spill] sm:$0xff] }
 0x109   :  { %868 = vmatpush.msra.mxu3 %v3326_v35  ;;  %885 = vmatpush.msra.mxu1 %v3327_v34  ;;  %v3374_v35 = vld [vmem:[#allocation93_spill] sm:$0xff]  ;;  %v3375_v34 = vld [vmem:[#allocation94_spill] sm:$0xff] }
 0x10a   :  { %912 = vmatpush.msra.mxu2 %v3328_v41  ;;  %929 = vmatpush.msra.mxu0 %v3329_v44  ;;  %v3376_v41 = vld [vmem:[#allocation95_spill] sm:$0xff]  ;;  %v3377_v44 = vld [vmem:[#allocation96_spill] sm:$0xff] }
 0x10b   :  { %869 = vmatpush.msra.mxu3 %v3330_v45  ;;  %886 = vmatpush.msra.mxu1 %v3331_v48  ;;  %v3378_v45 = vld [vmem:[#allocation97_spill] sm:$0xff]  ;;  %v3379_v48 = vld [vmem:[#allocation98_spill] sm:$0xff] }
 0x10c   :  { %913 = vmatpush.msra.mxu2 %v3332_v49  ;;  %930 = vmatpush.msra.mxu0 %v3333_v55  ;;  %v3380_v49 = vld [vmem:[#allocation99_spill] sm:$0xff]  ;;  %v3381_v55 = vld [vmem:[#allocation100_spill] sm:$0xff] }
 0x10d   :  { %870 = vmatpush.msra.mxu3 %v3334_v56  ;;  %887 = vmatpush.msra.mxu1 %v3335_v58  ;;  %v3382_v56 = vld [vmem:[#allocation101_spill] sm:$0xff]  ;;  %v3383_v58 = vld [vmem:[#allocation102_spill] sm:$0xff] }
 0x10e   :  { %914 = vmatpush.msra.mxu2 %v3336_v59  ;;  %931 = vmatpush.msra.mxu0 %v3337_v60  ;;  %v3384_v59 = vld [vmem:[#allocation103_spill] sm:$0xff]  ;;  %v3385_v60 = vld [vmem:[#allocation104_spill] sm:$0xff] }
 0x10f   :  { %871 = vmatpush.msra.mxu3 %v3338_v62  ;;  %888 = vmatpush.msra.mxu1 %v3339_v63  ;;  %v3386_v62 = vld [vmem:[#allocation105_spill] sm:$0xff]  ;;  %v3387_v63 = vld [vmem:[#allocation106_spill] sm:$0xff] }
 0x110   :  { %915 = vmatpush.msra.mxu2 %v3340_v0  ;;  %932 = vmatpush.msra.mxu0 %v3341_v1  ;;  %v3388_v0 = vld [vmem:[#allocation107_spill] sm:$0xff]  ;;  %v3389_v1 = vld [vmem:[#allocation108_spill] sm:$0xff] }
 0x111   :  { %872 = vmatpush.msra.mxu3 %v3342_v2  ;;  %889 = vmatpush.msra.mxu1 %v3343_v61  ;;  %v3390_v2 = vld [vmem:[#allocation109_spill] sm:$0xff]  ;;  %v3391_v61 = vld [vmem:[#allocation110_spill] sm:$0xff] }
 0x112   :  { %916 = vmatpush.msra.mxu2 %v3344_v3  ;;  %933 = vmatpush.msra.mxu0 %v3345_v4  ;;  %v3392_v3 = vld [vmem:[#allocation111_spill] sm:$0xff]  ;;  %v3393_v4 = vld [vmem:[#allocation112_spill] sm:$0xff] }
 0x113   :  { %873 = vmatpush.msra.mxu3 %v3346_v5  ;;  %890 = vmatpush.msra.mxu1 %v3347_v7  ;;  %v3394_v5 = vld [vmem:[#allocation113_spill] sm:$0xff]  ;;  %v3395_v7 = vld [vmem:[#allocation114_spill] sm:$0xff] }
 0x114   :  { %917 = vmatpush.msra.mxu2 %v3348_v8  ;;  %934 = vmatpush.msra.mxu0 %v3349_v9  ;;  %v3396_v8 = vld [vmem:[#allocation115_spill] sm:$0xff]  ;;  %v3397_v9 = vld [vmem:[#allocation116_spill] sm:$0xff] }
 0x115   :  { %874 = vmatpush.msra.mxu3 %v3350_v10  ;;  %891 = vmatpush.msra.mxu1 %v3351_v11  ;;  %v3398_v10 = vld [vmem:[#allocation117_spill] sm:$0xff]  ;;  %v3399_v11 = vld [vmem:[#allocation118_spill] sm:$0xff] }
 0x116   :  { %918 = vmatpush.msra.mxu2 %v3352_v13  ;;  %935 = vmatpush.msra.mxu0 %v3353_v14  ;;  %v3401_v13 = vld [vmem:[#allocation120_spill] sm:$0xff]  ;;  %v3402_v14 = vld [vmem:[#allocation121_spill] sm:$0xff] }
 0x117   :  { %875 = vmatmul.f32.vlgmr.msra.gmra.mxu3 %v855_v12  ;;  %892 = vmatpush.msra.mxu1 %v3354_v15  ;;  %v3400_v12 = vld [vmem:[#allocation119_spill] sm:$0xff]  ;;  %v3403_v15 = vld [vmem:[#allocation122_spill] sm:$0xff] }
 0x118   :  { %949 = vmatpush.msrb.mxu3 %v3355_v17  ;;  %919 = vmatpush.msra.mxu2 %v3356_v18  ;;  %v3405_v17 = vld [vmem:[#allocation124_spill] sm:$0xff]  ;;  %v3406_v18 = vld [vmem:[#allocation125_spill] sm:$0xff] }
 0x119   :  { %936 = vmatpush.msra.mxu0 %v3357_v19  ;;  %920 = vmatmul.f32.vlgmr.msra.gmra.mxu2 %v900_v16  ;;  %v3404_v16 = vld [vmem:[#allocation123_spill] sm:$0xff]  ;;  %v3407_v19 = vld [vmem:[#allocation126_spill] sm:$0xff] }
 0x11a   :  { %950 = vmatpush.msrb.mxu3 %v3358_v20  ;;  %994 = vmatpush.msrb.mxu2 %v3359_v21  ;;  %v3408_v20 = vld [vmem:[#allocation127_spill] sm:$0xff]  ;;  %v3409_v21 = vld [vmem:[#allocation128_spill] sm:$0xff] }
 0x11b   :  { %893 = vmatpush.msra.mxu1 %v3360_v22  ;;  %937 = vmatpush.msra.mxu0 %v3361_v23  ;;  %v3410_v22 = vld [vmem:[#allocation129_spill] sm:$0xff]  ;;  %v3411_v23 = vld [vmem:[#allocation130_spill] sm:$0xff] }
 0x11c   :  { %951 = vmatpush.msrb.mxu3 %v3362_v24  ;;  %995 = vmatpush.msrb.mxu2 %v3363_v25  ;;  %v3412_v24 = vld [vmem:[#allocation131_spill] sm:$0xff]  ;;  %v3413_v25 = vld [vmem:[#allocation132_spill] sm:$0xff] }
 0x11d   :  { %894 = vmatpush.msra.mxu1 %v3364_v27  ;;  %938 = vmatpush.msra.mxu0 %v3365_v28  ;;  %v3414_v27 = vld [vmem:[#allocation133_spill] sm:$0xff]  ;;  %v3415_v28 = vld [vmem:[#allocation134_spill] sm:$0xff] }
 0x11e   :  { %895 = vmatmul.f32.vlgmr.msra.gmra.mxu1 %v856_v26  ;;  %952 = vmatpush.msrb.mxu3 %v3366_v29  ;;  %v945_v26 = vrot.slane %v2853_v52, 4  ;;  %v990_v29 = vrot.slane %v2853_v52, 5 }
 0x11f   :  { %969 = vmatpush.msrb.mxu1 %v3367_v30  ;;  %996 = vmatpush.msrb.mxu2 %v3368_v31 }
 0x120   :  { %939 = vmatpush.msra.mxu0 %v3369_v33  ;;  %953 = vmatpush.msrb.mxu3 %v3370_v36 }
 0x121   :  { %940 = vmatmul.f32.vlgmr.msra.gmra.mxu0 %v901_v32  ;;  %970 = vmatpush.msrb.mxu1 %v3371_v37 }
 0x122   :  { %997 = vmatpush.msrb.mxu2 %v3372_v42  ;;  %1014 = vmatpush.msrb.mxu0 %v3373_v51 }
 0x123   :  { %954 = vmatpush.msrb.mxu3 %v3374_v35  ;;  %971 = vmatpush.msrb.mxu1 %v3375_v34 }
 0x124   :  { %998 = vmatpush.msrb.mxu2 %v3376_v41  ;;  %1015 = vmatpush.msrb.mxu0 %v3377_v44 }
 0x125   :  { %955 = vmatpush.msrb.mxu3 %v3378_v45  ;;  %972 = vmatpush.msrb.mxu1 %v3379_v48 }
 0x126   :  { %999 = vmatpush.msrb.mxu2 %v3380_v49  ;;  %1016 = vmatpush.msrb.mxu0 %v3381_v55 }
 0x127   :  { %956 = vmatpush.msrb.mxu3 %v3382_v56  ;;  %973 = vmatpush.msrb.mxu1 %v3383_v58 }
 0x128   :  { %1000 = vmatpush.msrb.mxu2 %v3384_v59  ;;  %1017 = vmatpush.msrb.mxu0 %v3385_v60 }
 0x129   :  { %957 = vmatpush.msrb.mxu3 %v3386_v62  ;;  %974 = vmatpush.msrb.mxu1 %v3387_v63 }
 0x12a   :  { %1001 = vmatpush.msrb.mxu2 %v3388_v0  ;;  %1018 = vmatpush.msrb.mxu0 %v3389_v1  ;;  %v451_v52 = vpop.f32.mrf.mxu0 }
 0x12b   :  { %958 = vmatpush.msrb.mxu3 %v3390_v2  ;;  %975 = vmatpush.msrb.mxu1 %v3391_v61 }
 0x12c   :  { %1002 = vmatpush.msrb.mxu2 %v3392_v3  ;;  %1019 = vmatpush.msrb.mxu0 %v3393_v4 }
 0x12d   :  { %959 = vmatpush.msrb.mxu3 %v3394_v5  ;;  %976 = vmatpush.msrb.mxu1 %v3395_v7 }
 0x12e   :  { %1003 = vmatpush.msrb.mxu2 %v3396_v8  ;;  %1020 = vmatpush.msrb.mxu0 %v3397_v9 }
 0x12f   :  { %960 = vmatpush.msrb.mxu3 %v3398_v10  ;;  %977 = vmatpush.msrb.mxu1 %v3399_v11 }
 0x130   :  { %1004 = vmatpush.msrb.mxu2 %v3400_v12  ;;  %1021 = vmatpush.msrb.mxu0 %v3401_v13 }
 0x131   :  { %961 = vmatpush.msrb.mxu3 %v3402_v14  ;;  %978 = vmatpush.msrb.mxu1 %v3403_v15 }
 0x132   :  { %1005 = vmatpush.msrb.mxu2 %v3404_v16  ;;  %1022 = vmatpush.msrb.mxu0 %v3405_v17 }
 0x133   :  { %962 = vmatpush.msrb.mxu3 %v3406_v18  ;;  %979 = vmatpush.msrb.mxu1 %v3407_v19 }
 0x134   :  { %1006 = vmatpush.msrb.mxu2 %v3408_v20  ;;  %1023 = vmatpush.msrb.mxu0 %v3409_v21 }
 0x135   :  { %963 = vmatpush.msrb.mxu3 %v3410_v22  ;;  %980 = vmatpush.msrb.mxu1 %v3411_v23 }
 0x136   :  { %1007 = vmatpush.msrb.mxu2 %v2715_v50  ;;  %1024 = vmatpush.msrb.mxu0 %v3412_v24  ;;  %v946_v50 = vrot.slane %v2872_v6, 4 }
 0x137   :  { %964 = vmatpush.msrb.mxu3 %v2727_v46  ;;  %981 = vmatpush.msrb.mxu1 %v3413_v25  ;;  %v991_v46 = vrot.slane %v2872_v6, 5 }
 0x138   :  { %1008 = vmatpush.msrb.mxu2 %v3414_v27  ;;  %1025 = vmatpush.msrb.mxu0 %v3415_v28 }
 0x139   :  { %965 = vmatmul.f32.vlgmr.msrb.gmra.mxu3 %v945_v26  ;;  %982 = vmatpush.msrb.mxu1 %v2751_v43  ;;  %v371_v43 = vpop.f32.mrf.mxu1 }
 0x13a   :  { %1009 = vmatpush.msrb.mxu2 %v2759_v47  ;;  %1026 = vmatpush.msrb.mxu0 %v2766_v39  ;;  %v351_v47 = vpop.f32.mrf.mxu3  ;;  %v431_v39 = vpop.f32.mrf.mxu2 }
 0x13b   :  { %1010 = vmatmul.f32.vlgmr.msrb.gmra.mxu2 %v990_v29  ;;  %983 = vmatpush.msrb.mxu1 %v2775_v57  ;;  %v372_v6 = vadd.f32 %v371_v43, %v351_v47  ;;  %v452_v45 = vadd.f32 %v451_v52, %v431_v39 }
 0x13c   :  { %1027 = vmatpush.msrb.mxu0 %v2780_v53  ;;  %v607_v53 = vpop.f32.mrf.mxu0 }
 0x13d   :  { %984 = vmatpush.msrb.mxu1 %v2788_v38 }
 0x13e   :  { %1028 = vmatpush.msrb.mxu0 %v2793_v40  ;;  %985 = vmatmul.f32.vlgmr.msrb.gmra.mxu1 %v946_v50 }
 0x140   :  { %1029 = vmatpush.msrb.mxu0 %v2805_v54  ;;  %v301_v54 = vld [vmem:[%s3024_s4] sm:$0x1]  ;;  %s1252_s4 = smov [#allocation2]  }
 0x141   :  { %1030 = vmatmul.f32.vlgmr.msrb.gmra.mxu0 %v991_v46  ;;  %v529_v57 = vpop.f32.mrf.mxu1  ;;  %v374_v44 = vadd.f32 %v372_v6, %v301_v54  ;;  %s1047_s29 = sshll.u32 %s1252_s4, 4  ;;  %s1048_s29 = int_to_ptr.vmem [resolvable:$true] %s1047_s29 }
 0x142   :  { %v509_v30 = vpop.f32.mrf.mxu3  ;;  %v587_v31 = vpop.f32.mrf.mxu2 }
 0x143   :  { %v530_v55 = vadd.f32 %v529_v57, %v509_v30  ;;  %v454_v60 = vadd.f32 %v452_v45, %v374_v44  ;;  %v608_v0 = vadd.f32 %v607_v53, %v587_v31 }
 0x145   :  { %v532_v63 = vadd.f32 %v530_v55, %v454_v60 }
 0x147   :  { %v610_v5 = vadd.f32 %v608_v0, %v532_v63 }
 0x157   :  { %v685_v33 = vpop.f32.mrf.mxu1 }
 0x158   :  { %v665_v32 = vpop.f32.mrf.mxu3 }
 0x159   :  { %v686_v61 = vadd.f32 %v685_v33, %v665_v32 }
 0x15a   :  { %v743_v36 = vpop.f32.mrf.mxu2  ;;  %v763_v38 = vpop.f32.mrf.mxu0 }
 0x15b   :  { %v688_v11 = vadd.f32 %v686_v61, %v610_v5  ;;  %v764_v12 = vadd.f32 %v763_v38, %v743_v36 }
 0x15d   :  { %v766_v16 = vadd.f32 %v764_v12, %v688_v11 }
 0x178   :  { %v784_v37 = vpop.f32.mrf.mxu3 }
 0x179   :  { %v804_v40 = vpop.f32.mrf.mxu1 }
 0x17a   :  { %v831_v42 = vpop.f32.mrf.mxu2  ;;  %v805_v35 = vadd.f32 %v804_v40, %v784_v37 }
 0x17c   :  { %v851_v51 = vpop.f32.mrf.mxu0  ;;  %v807_v48 = vadd.f32 %v805_v35, %v301_v54 }
 0x17d   :  { %v852_v49 = vadd.f32 %v851_v51, %v831_v42 }
 0x17f   :  { %v854_v62 = vadd.f32 %v852_v49, %v807_v48 }
 0x19a   :  { %v876_v34 = vpop.f32.mrf.mxu3 }
 0x19b   :  { %v896_v41 = vpop.f32.mrf.mxu1 }
 0x19c   :  { %v897_v56 = vadd.f32 %v896_v41, %v876_v34  ;;  %v921_v58 = vpop.f32.mrf.mxu2 }
 0x19e   :  { %v941_v59 = vpop.f32.mrf.mxu0  ;;  %v899_v1 = vadd.f32 %v897_v56, %v854_v62 }
 0x19f   :  { %v942_v2 = vadd.f32 %v941_v59, %v921_v58 }
 0x1a1   :  { %v944_v7 = vadd.f32 %v942_v2, %v899_v1 }
 0x1bb   :  { %v986_v3 = vpop.f32.mrf.mxu1 }
 0x1bc   :  { %v966_v4 = vpop.f32.mrf.mxu3 }
 0x1bd   :  { %v987_v8 = vadd.f32 %v986_v3, %v966_v4 }
 0x1be   :  { %v1011_v9 = vpop.f32.mrf.mxu2  ;;  %v1031_v10 = vpop.f32.mrf.mxu0 }
 0x1bf   :  { %v989_v13 = vadd.f32 %v987_v8, %v944_v7  ;;  %v1032_v14 = vadd.f32 %v1031_v10, %v1011_v9 }
 0x1c1   :  { %v1034_v15 = vadd.f32 %v1032_v14, %v989_v13 }
 0x1c3   :  { %v1036_v17 = vperm.slane %v1034_v15, 0 }
 0x1c5   :  { %v1039_v18 = vsel %vm1038_vm1, %v766_v16, %v1036_v17 }
 0x1c6   :  { %1041 = vst.msk [vmem:[#allocation2] sm:$0x3] %vm1040_vm2, %v1039_v18 }
 0x1c7   :  { %1052 = dma.vmem_to_hbm [thread:$0]  %s1048_s29, 32, %s1050_s6, [#allocation3]  }
 0x1c8   :  { %1249 = dma.done.wait [#allocation3], 32  }
 0x1c9   :  { %1250 = vsyncadd [#allocation3], 4294967264 }
 0x1ca   :  { %1057 = vsyncpa [#allocation3], 1 }

</bundles_post_ra>
